<compile_context>
chip_gen: v7x
topology: tpu7x:2x2x1
jax: 0.10.0
libtpu: 0.0.40
codegen_flags: <defaults>
</compile_context>

<pallas_src>
import functools

import jax
import jax.numpy as jnp
from jax.experimental import pallas as pl
from jax.experimental.pallas import tpu as pltpu


_VMEM = pl.BlockSpec(memory_space=pltpu.MemorySpace.VMEM)


# ----------------------------------------------------------------------------
# Pallas kernel: target BiLSTM -> text BiLSTM (conditioned) -> classifier
# ----------------------------------------------------------------------------
def bicond_kernel(tgt_x_ref, doc_x_ref,
                  tgt_w_ih_ref, tgt_w_hh_ref, tgt_b_ref,
                  txt_w_ih_ref, txt_w_hh_ref, txt_b_ref,
                  cls_w_ref, cls_b_ref,
                  logits_ref,
                  tgt_xg_ref, doc_xg_ref,
                  *, batch_padded, hidden):
    """Fused BiCond forward.

    tgt_x/doc_x : (L*Bp, 2G) time-major rows; columns = [x_t | x_{L-1-t}].
    w_ih        : (2G, 8H) block-diag over the two input halves, columns
                  ordered per-gate [i_f i_b f_f f_b g_f g_b o_f o_b].
    w_hh        : (2H, 8H) block-diag over [h_f rows | h_b rows], same column
                  order.
    b           : (1, 8H) fused bias (b_ih + b_hh per direction).
    cls_w/cls_b : (2H, N) / (1, N) classifier.
    *_xg_ref    : VMEM scratch for hoisted input projections.
    """
    Bp, H = batch_padded, hidden
    H2, H4, H6, H8 = 2 * H, 4 * H, 6 * H, 8 * H

    # --- Hoisted input projections (both LSTMs), issued up front so the doc
    # projection hides under the target recurrence. ---------------------------
    tgt_xg_ref[...] = (
        jnp.dot(tgt_x_ref[...], tgt_w_ih_ref[...],
                preferred_element_type=jnp.float32) + tgt_b_ref[...])
    doc_xg_ref[...] = (
        jnp.dot(doc_x_ref[...], txt_w_ih_ref[...],
                preferred_element_type=jnp.float32) + txt_b_ref[...])

    # --- Fused fwd/bwd recurrence: h, c are (Bp, 2H) = [fwd | bwd]. ----------
    def run(xg_ref, w_hh, h, c):
        L = xg_ref.shape[0] // Bp
        # Fully unrolled: L is small & static, keeps LLO scheduler visibility.
        for t in range(L):
            rec = jnp.dot(h, w_hh, preferred_element_type=jnp.float32)  # (Bp,8H)
            gates = xg_ref[t * Bp:(t + 1) * Bp, :] + rec                # aligned
            sig = jax.nn.sigmoid(gates)                                 # (Bp,8H)
            g = jnp.tanh(gates[:, H4:H6])                               # (Bp,2H)
            c = sig[:, H2:H4] * c + sig[:, 0:H2] * g
            h = sig[:, H6:H8] * jnp.tanh(c)
        return h, c

    zeros = jnp.zeros((Bp, H2), jnp.float32)

    # Target BiLSTM from zero initial state (PyTorch default).
    th, tc = run(tgt_xg_ref, tgt_w_hh_ref[...], zeros, zeros)
    # Text BiLSTM conditioned on the target's final (h, c) per direction.
    xh, _ = run(doc_xg_ref, txt_w_hh_ref[...], th, tc)

    # txt_hn.transpose(0,1).reshape(B, 2H) == [h_fwd | h_bwd] == xh directly.
    # Classifier epilogue fused into the same kernel (dropout is identity).
    logits_ref[...] = (
        jnp.dot(xh, cls_w_ref[...], preferred_element_type=jnp.float32)
        + cls_b_ref[...])


# ----------------------------------------------------------------------------
# Parameter fusion helpers (per-direction PyTorch-style -> fused kernel layout)
# ----------------------------------------------------------------------------
def _interleave_gates(wf, wb, hidden):
    """Columns [i f g o] per direction -> [i_f i_b f_f f_b g_f g_b o_f o_b]."""
    H = hidden
    cols = []
    for q in range(4):
        cols.append(wf[:, q * H:(q + 1) * H])
        cols.append(wb[:, q * H:(q + 1) * H])
    return jnp.concatenate(cols, axis=1)


def _fuse_lstm(p, hidden):
    H = hidden
    zih = jnp.zeros_like(p["w_ih_f"])
    zhh = jnp.zeros_like(p["w_hh_f"])
    # (2G, 8H): top rows consume x_t (fwd cols), bottom rows x_{L-1-t} (bwd).
    w_ih = jnp.concatenate([
        _interleave_gates(p["w_ih_f"], zih, H),
        _interleave_gates(zih, p["w_ih_b"], H),
    ], axis=0)
    # (2H, 8H): block-diag over [h_f rows | h_b rows].
    w_hh = jnp.concatenate([
        _interleave_gates(p["w_hh_f"], zhh, H),
        _interleave_gates(zhh, p["w_hh_b"], H),
    ], axis=0)
    b = _interleave_gates(p["b_f"], p["b_b"], H)                       # (1, 8H)
    return w_ih, w_hh, b


# ----------------------------------------------------------------------------
# BiCond forward (glue in plain JAX, all heavy lifting in one pallas_call)
# ----------------------------------------------------------------------------
def _prep_input(x_btg, batch_padded):
    """(B, L, G) -> (L*Bp, 2G) time-major rows [x_t | x_{L-1-t}], 8-row padded."""
    B, L, G = x_btg.shape
    x_p = jnp.pad(x_btg, ((0, batch_padded - B), (0, 0), (0, 0)))
    x_tm = jnp.transpose(x_p, (1, 0, 2))                      # (L, Bp, G)
    x_cat = jnp.concatenate([x_tm, x_tm[::-1]], axis=-1)      # (L, Bp, 2G)
    return x_cat.reshape(L * batch_padded, 2 * G)


@jax.jit
def bicond_forward(params, input_ids, target_ids):
    embs = params["embedding"]                      # (V, G)
    H = params["text"]["w_hh_f"].shape[0]
    B, Ld = input_ids.shape
    Lt = target_ids.shape[1]
    Bp = max(8, -(-B // 8) * 8)                     # pad batch to 8 sublanes

    doc = jnp.take(embs, input_ids, axis=0).astype(jnp.float32)   # (B, Ld, G)
    tgt = jnp.take(embs, target_ids, axis=0).astype(jnp.float32)  # (B, Lt, G)

    doc2d = _prep_input(doc, Bp)                    # (Ld*Bp, 2G)
    tgt2d = _prep_input(tgt, Bp)                    # (Lt*Bp, 2G)

    t_wih, t_whh, t_b = _fuse_lstm(params["target"], H)
    x_wih, x_whh, x_b = _fuse_lstm(params["text"], H)
    N = params["cls_w"].shape[1]

    logits_p = pl.pallas_call(
        functools.partial(bicond_kernel, batch_padded=Bp, hidden=H),
        out_shape=jax.ShapeDtypeStruct((Bp, N), jnp.float32),
        in_specs=[_VMEM] * 10,
        out_specs=_VMEM,
        scratch_shapes=[pltpu.VMEM((Lt * Bp, 8 * H), jnp.float32),
                        pltpu.VMEM((Ld * Bp, 8 * H), jnp.float32)],
    )(tgt2d, doc2d,
      t_wih, t_whh, t_b,
      x_wih, x_whh, x_b,
      params["cls_w"], params["cls_b"])
    # Drop padded batch rows (they run through the recurrence but are garbage).
    return logits_p[:B], None


# ----------------------------------------------------------------------------
# Pure-JAX reference (torch.nn.LSTM semantics) for correctness check
# ----------------------------------------------------------------------------
def _lstm_dir_ref(x_tm, w_ih, w_hh, b, h0, c0, reverse):
    H = w_hh.shape[0]

    def step(carry, xt):
        h, c = carry
        gates = xt @ w_ih + h @ w_hh + b
        i = jax.nn.sigmoid(gates[:, :H])
        f = jax.nn.sigmoid(gates[:, H:2 * H])
        g = jnp.tanh(gates[:, 2 * H:3 * H])
        o = jax.nn.sigmoid(gates[:, 3 * H:])
        c = f * c + i * g
        h = o * jnp.tanh(c)
        return (h, c), None

    xs = x_tm[::-1] if reverse else x_tm
    (h, c), _ = jax.lax.scan(step, (h0, c0), xs)
    return h, c


def _bilstm_ref(x_tm, p, h0, c0):
    hf, cf = _lstm_dir_ref(x_tm, p["w_ih_f"], p["w_hh_f"], p["b_f"],
                           h0[0], c0[0], reverse=False)
    hb, cb = _lstm_dir_ref(x_tm, p["w_ih_b"], p["w_hh_b"], p["b_b"],
                           h0[1], c0[1], reverse=True)
    return jnp.stack([hf, hb]), jnp.stack([cf, cb])


def bicond_forward_ref(params, input_ids, target_ids):
    embs = params["embedding"]
    H = params["text"]["w_hh_f"].shape[0]
    doc_tm = jnp.transpose(jnp.take(embs, input_ids, axis=0), (1, 0, 2))
    tgt_tm = jnp.transpose(jnp.take(embs, target_ids, axis=0), (1, 0, 2))
    B = input_ids.shape[0]
    zeros = jnp.zeros((2, B, H), jnp.float32)
    tgt_hn, tgt_cn = _bilstm_ref(tgt_tm, params["target"], zeros, zeros)
    txt_hn, _ = _bilstm_ref(doc_tm, params["text"], tgt_hn, tgt_cn)
    out = jnp.transpose(txt_hn, (1, 0, 2)).reshape(B, 2 * H)
    return out @ params["cls_w"] + params["cls_b"], None


# ----------------------------------------------------------------------------
# Deterministic parameter construction
# ----------------------------------------------------------------------------
def make_params(key, vocab, glove_hidden, hidden, num_labels):
    ks = jax.random.split(key, 16)
    k = 1.0 / jnp.sqrt(hidden)

    def u(kk, shape):
        return jax.random.uniform(kk, shape, jnp.float32, -k, k)

    def lstm_params(kk, in_dim):
        sub = jax.random.split(kk, 8)
        return {
            "w_ih_f": u(sub[0], (in_dim, 4 * hidden)),
            "w_hh_f": u(sub[1], (hidden, 4 * hidden)),
            "b_f": u(sub[2], (1, 4 * hidden)) + u(sub[3], (1, 4 * hidden)),
            "w_ih_b": u(sub[4], (in_dim, 4 * hidden)),
            "w_hh_b": u(sub[5], (hidden, 4 * hidden)),
            "b_b": u(sub[6], (1, 4 * hidden)) + u(sub[7], (1, 4 * hidden)),
        }

    # synthetic "GloVe" table (replaces pickle-loaded embedding checkpoint)
    embedding = jax.random.normal(ks[0], (vocab, glove_hidden), jnp.float32) * 0.1
    return {
        "embedding": embedding,
        "target": lstm_params(ks[1], glove_hidden),
        "text": lstm_params(ks[2], glove_hidden),
        "cls_w": u(ks[3], (2 * hidden, num_labels)),
        "cls_b": u(ks[4], (1, num_labels)),
    }


# ----------------------------------------------------------------------------
if __name__ == "__main__":
    VOCAB = 64
    GLOVE_HIDDEN = 32
    HIDDEN = 32
    NUM_LABELS = 3
    B, L_DOC, L_TGT = 2, 16, 8

    root = jax.random.PRNGKey(0)
    k_params, k_doc, k_tgt = jax.random.split(root, 3)

    params = make_params(k_params, VOCAB, GLOVE_HIDDEN, HIDDEN, NUM_LABELS)
    input_ids = jax.random.randint(k_doc, (B, L_DOC), 0, VOCAB, jnp.int32)
    target_ids = jax.random.randint(k_tgt, (B, L_TGT), 0, VOCAB, jnp.int32)

    logits, _ = bicond_forward(params, input_ids, target_ids)
    logits = jax.block_until_ready(logits)

    ref_logits, _ = bicond_forward_ref(params, input_ids, target_ids)
    assert logits.shape == (B, NUM_LABELS)
    assert jnp.allclose(logits, ref_logits, rtol=1e-4, atol=1e-4), (
        "Pallas kernel output mismatch vs pure-JAX reference")

    print("KERNEL_OK")
</pallas_src>

<mosaic_0001>
module attributes {stable_mosaic.version = 11 : i64} {
  func.func @bicond_kernel(%arg0: memref<64x64xf32, #tpu.memory_space<vmem>>, %arg1: memref<128x64xf32, #tpu.memory_space<vmem>>, %arg2: memref<64x256xf32, #tpu.memory_space<vmem>>, %arg3: memref<64x256xf32, #tpu.memory_space<vmem>>, %arg4: memref<1x256xf32, #tpu.memory_space<vmem>>, %arg5: memref<64x256xf32, #tpu.memory_space<vmem>>, %arg6: memref<64x256xf32, #tpu.memory_space<vmem>>, %arg7: memref<1x256xf32, #tpu.memory_space<vmem>>, %arg8: memref<64x3xf32, #tpu.memory_space<vmem>>, %arg9: memref<1x3xf32, #tpu.memory_space<vmem>>, %arg10: memref<8x3xf32, #tpu.memory_space<vmem>>, %arg11: memref<64x256xf32, #tpu.memory_space<vmem>>, %arg12: memref<128x256xf32, #tpu.memory_space<vmem>>) attributes {dimension_semantics = [], scalar_prefetch = 0 : i64, scratch_operands = 2 : i64, tpu.core_type = #tpu.core_type<tc>} {
    %c0 = arith.constant 0 : index
    %c0_0 = arith.constant 0 : index
    %0 = vector.load %arg0[%c0, %c0_0] : memref<64x64xf32, #tpu.memory_space<vmem>>, vector<64x64xf32>
    %c0_1 = arith.constant 0 : index
    %c0_2 = arith.constant 0 : index
    %1 = vector.load %arg2[%c0_1, %c0_2] : memref<64x256xf32, #tpu.memory_space<vmem>>, vector<64x256xf32>
    %cst = arith.constant dense<0.000000e+00> : vector<64x256xf32>
    %2 = tpu.matmul %0, %1, %cst {dimension_numbers = #tpu.dot_dimension_numbers<[1], [0], [0], [1], [0, 0, 1, 1], [], []>} : vector<64x64xf32>, vector<64x256xf32>, vector<64x256xf32> -> vector<64x256xf32>
    %c0_3 = arith.constant 0 : index
    %c0_4 = arith.constant 0 : index
    %3 = vector.load %arg4[%c0_3, %c0_4] : memref<1x256xf32, #tpu.memory_space<vmem>>, vector<1x256xf32>
    %4 = vector.broadcast %3 : vector<1x256xf32> to vector<64x256xf32>
    %5 = arith.addf %2, %4 : vector<64x256xf32>
    %c0_5 = arith.constant 0 : index
    %c0_6 = arith.constant 0 : index
    %6 = vector.load %arg11[%c0_5, %c0_6] : memref<64x256xf32, #tpu.memory_space<vmem>>, vector<64x256xf32>
    tpu.vector_store %arg11[%c0_5, %c0_6], %5 {strides = array<i32>} : memref<64x256xf32, #tpu.memory_space<vmem>>, vector<64x256xf32>,
    %c0_7 = arith.constant 0 : index
    %c0_8 = arith.constant 0 : index
    %7 = vector.load %arg1[%c0_7, %c0_8] : memref<128x64xf32, #tpu.memory_space<vmem>>, vector<128x64xf32>
    %c0_9 = arith.constant 0 : index
    %c0_10 = arith.constant 0 : index
    %8 = vector.load %arg5[%c0_9, %c0_10] : memref<64x256xf32, #tpu.memory_space<vmem>>, vector<64x256xf32>
    %cst_11 = arith.constant dense<0.000000e+00> : vector<128x256xf32>
    %9 = tpu.matmul %7, %8, %cst_11 {dimension_numbers = #tpu.dot_dimension_numbers<[1], [0], [0], [1], [0, 0, 1, 1], [], []>} : vector<128x64xf32>, vector<64x256xf32>, vector<128x256xf32> -> vector<128x256xf32>
    %c0_12 = arith.constant 0 : index
    %c0_13 = arith.constant 0 : index
    %10 = vector.load %arg7[%c0_12, %c0_13] : memref<1x256xf32, #tpu.memory_space<vmem>>, vector<1x256xf32>
    %11 = vector.broadcast %10 : vector<1x256xf32> to vector<128x256xf32>
    %12 = arith.addf %9, %11 : vector<128x256xf32>
    %c0_14 = arith.constant 0 : index
    %c0_15 = arith.constant 0 : index
    %13 = vector.load %arg12[%c0_14, %c0_15] : memref<128x256xf32, #tpu.memory_space<vmem>>, vector<128x256xf32>
    tpu.vector_store %arg12[%c0_14, %c0_15], %12 {strides = array<i32>} : memref<128x256xf32, #tpu.memory_space<vmem>>, vector<128x256xf32>,
    %cst_16 = arith.constant 0.000000e+00 : f32
    %14 = vector.broadcast %cst_16 : f32 to vector<8x64xf32>
    %c0_17 = arith.constant 0 : index
    %c0_18 = arith.constant 0 : index
    %15 = vector.load %arg3[%c0_17, %c0_18] : memref<64x256xf32, #tpu.memory_space<vmem>>, vector<64x256xf32>
    %cst_19 = arith.constant dense<0.000000e+00> : vector<8x256xf32>
    %16 = tpu.matmul %14, %15, %cst_19 {dimension_numbers = #tpu.dot_dimension_numbers<[1], [0], [0], [1], [0, 0, 1, 1], [], []>} : vector<8x64xf32>, vector<64x256xf32>, vector<8x256xf32> -> vector<8x256xf32>
    %c0_20 = arith.constant 0 : index
    %c0_21 = arith.constant 0 : index
    %17 = vector.load %arg11[%c0_20, %c0_21] : memref<64x256xf32, #tpu.memory_space<vmem>>, vector<8x256xf32>
    %18 = arith.addf %17, %16 : vector<8x256xf32>
    %19 = arith.negf %18 : vector<8x256xf32>
    %20 = math.exp %19 : vector<8x256xf32>
    %cst_22 = arith.constant 1.000000e+00 : f32
    %21 = vector.broadcast %cst_22 : f32 to vector<8x256xf32>
    %22 = arith.addf %21, %20 : vector<8x256xf32>
    %23 = arith.divf %21, %22 : vector<8x256xf32>
    %24 = vector.extract_strided_slice %18 {offsets = [0, 128], sizes = [8, 64], strides = [1, 1]} : vector<8x256xf32> to vector<8x64xf32>
    %25 = math.tanh %24 : vector<8x64xf32>
    %26 = vector.extract_strided_slice %23 {offsets = [0, 64], sizes = [8, 64], strides = [1, 1]} : vector<8x256xf32> to vector<8x64xf32>
    %27 = arith.mulf %26, %14 : vector<8x64xf32>
    %28 = vector.extract_strided_slice %23 {offsets = [0, 0], sizes = [8, 64], strides = [1, 1]} : vector<8x256xf32> to vector<8x64xf32>
    %29 = arith.mulf %28, %25 : vector<8x64xf32>
    %30 = arith.addf %27, %29 : vector<8x64xf32>
    %31 = vector.extract_strided_slice %23 {offsets = [0, 192], sizes = [8, 64], strides = [1, 1]} : vector<8x256xf32> to vector<8x64xf32>
    %32 = math.tanh %30 : vector<8x64xf32>
    %33 = arith.mulf %31, %32 : vector<8x64xf32>
    %cst_23 = arith.constant dense<0.000000e+00> : vector<8x256xf32>
    %34 = tpu.matmul %33, %15, %cst_23 {dimension_numbers = #tpu.dot_dimension_numbers<[1], [0], [0], [1], [0, 0, 1, 1], [], []>} : vector<8x64xf32>, vector<64x256xf32>, vector<8x256xf32> -> vector<8x256xf32>
    %c8 = arith.constant 8 : index
    %c0_24 = arith.constant 0 : index
    %35 = vector.load %arg11[%c8, %c0_24] : memref<64x256xf32, #tpu.memory_space<vmem>>, vector<8x256xf32>
    %36 = arith.addf %35, %34 : vector<8x256xf32>
    %37 = arith.negf %36 : vector<8x256xf32>
    %38 = math.exp %37 : vector<8x256xf32>
    %cst_25 = arith.constant 1.000000e+00 : f32
    %39 = vector.broadcast %cst_25 : f32 to vector<8x256xf32>
    %40 = arith.addf %39, %38 : vector<8x256xf32>
    %41 = arith.divf %39, %40 : vector<8x256xf32>
    %42 = vector.extract_strided_slice %36 {offsets = [0, 128], sizes = [8, 64], strides = [1, 1]} : vector<8x256xf32> to vector<8x64xf32>
    %43 = math.tanh %42 : vector<8x64xf32>
    %44 = vector.extract_strided_slice %41 {offsets = [0, 64], sizes = [8, 64], strides = [1, 1]} : vector<8x256xf32> to vector<8x64xf32>
    %45 = arith.mulf %44, %30 : vector<8x64xf32>
    %46 = vector.extract_strided_slice %41 {offsets = [0, 0], sizes = [8, 64], strides = [1, 1]} : vector<8x256xf32> to vector<8x64xf32>
    %47 = arith.mulf %46, %43 : vector<8x64xf32>
    %48 = arith.addf %45, %47 : vector<8x64xf32>
    %49 = vector.extract_strided_slice %41 {offsets = [0, 192], sizes = [8, 64], strides = [1, 1]} : vector<8x256xf32> to vector<8x64xf32>
    %50 = math.tanh %48 : vector<8x64xf32>
    %51 = arith.mulf %49, %50 : vector<8x64xf32>
    %cst_26 = arith.constant dense<0.000000e+00> : vector<8x256xf32>
    %52 = tpu.matmul %51, %15, %cst_26 {dimension_numbers = #tpu.dot_dimension_numbers<[1], [0], [0], [1], [0, 0, 1, 1], [], []>} : vector<8x64xf32>, vector<64x256xf32>, vector<8x256xf32> -> vector<8x256xf32>
    %c16 = arith.constant 16 : index
    %c0_27 = arith.constant 0 : index
    %53 = vector.load %arg11[%c16, %c0_27] : memref<64x256xf32, #tpu.memory_space<vmem>>, vector<8x256xf32>
    %54 = arith.addf %53, %52 : vector<8x256xf32>
    %55 = arith.negf %54 : vector<8x256xf32>
    %56 = math.exp %55 : vector<8x256xf32>
    %cst_28 = arith.constant 1.000000e+00 : f32
    %57 = vector.broadcast %cst_28 : f32 to vector<8x256xf32>
    %58 = arith.addf %57, %56 : vector<8x256xf32>
    %59 = arith.divf %57, %58 : vector<8x256xf32>
    %60 = vector.extract_strided_slice %54 {offsets = [0, 128], sizes = [8, 64], strides = [1, 1]} : vector<8x256xf32> to vector<8x64xf32>
    %61 = math.tanh %60 : vector<8x64xf32>
    %62 = vector.extract_strided_slice %59 {offsets = [0, 64], sizes = [8, 64], strides = [1, 1]} : vector<8x256xf32> to vector<8x64xf32>
    %63 = arith.mulf %62, %48 : vector<8x64xf32>
    %64 = vector.extract_strided_slice %59 {offsets = [0, 0], sizes = [8, 64], strides = [1, 1]} : vector<8x256xf32> to vector<8x64xf32>
    %65 = arith.mulf %64, %61 : vector<8x64xf32>
    %66 = arith.addf %63, %65 : vector<8x64xf32>
    %67 = vector.extract_strided_slice %59 {offsets = [0, 192], sizes = [8, 64], strides = [1, 1]} : vector<8x256xf32> to vector<8x64xf32>
    %68 = math.tanh %66 : vector<8x64xf32>
    %69 = arith.mulf %67, %68 : vector<8x64xf32>
    %cst_29 = arith.constant dense<0.000000e+00> : vector<8x256xf32>
    %70 = tpu.matmul %69, %15, %cst_29 {dimension_numbers = #tpu.dot_dimension_numbers<[1], [0], [0], [1], [0, 0, 1, 1], [], []>} : vector<8x64xf32>, vector<64x256xf32>, vector<8x256xf32> -> vector<8x256xf32>
    %c24 = arith.constant 24 : index
    %c0_30 = arith.constant 0 : index
    %71 = vector.load %arg11[%c24, %c0_30] : memref<64x256xf32, #tpu.memory_space<vmem>>, vector<8x256xf32>
    %72 = arith.addf %71, %70 : vector<8x256xf32>
    %73 = arith.negf %72 : vector<8x256xf32>
    %74 = math.exp %73 : vector<8x256xf32>
    %cst_31 = arith.constant 1.000000e+00 : f32
    %75 = vector.broadcast %cst_31 : f32 to vector<8x256xf32>
    %76 = arith.addf %75, %74 : vector<8x256xf32>
    %77 = arith.divf %75, %76 : vector<8x256xf32>
    %78 = vector.extract_strided_slice %72 {offsets = [0, 128], sizes = [8, 64], strides = [1, 1]} : vector<8x256xf32> to vector<8x64xf32>
    %79 = math.tanh %78 : vector<8x64xf32>
    %80 = vector.extract_strided_slice %77 {offsets = [0, 64], sizes = [8, 64], strides = [1, 1]} : vector<8x256xf32> to vector<8x64xf32>
    %81 = arith.mulf %80, %66 : vector<8x64xf32>
    %82 = vector.extract_strided_slice %77 {offsets = [0, 0], sizes = [8, 64], strides = [1, 1]} : vector<8x256xf32> to vector<8x64xf32>
    %83 = arith.mulf %82, %79 : vector<8x64xf32>
    %84 = arith.addf %81, %83 : vector<8x64xf32>
    %85 = vector.extract_strided_slice %77 {offsets = [0, 192], sizes = [8, 64], strides = [1, 1]} : vector<8x256xf32> to vector<8x64xf32>
    %86 = math.tanh %84 : vector<8x64xf32>
    %87 = arith.mulf %85, %86 : vector<8x64xf32>
    %cst_32 = arith.constant dense<0.000000e+00> : vector<8x256xf32>
    %88 = tpu.matmul %87, %15, %cst_32 {dimension_numbers = #tpu.dot_dimension_numbers<[1], [0], [0], [1], [0, 0, 1, 1], [], []>} : vector<8x64xf32>, vector<64x256xf32>, vector<8x256xf32> -> vector<8x256xf32>
    %c32 = arith.constant 32 : index
    %c0_33 = arith.constant 0 : index
    %89 = vector.load %arg11[%c32, %c0_33] : memref<64x256xf32, #tpu.memory_space<vmem>>, vector<8x256xf32>
    %90 = arith.addf %89, %88 : vector<8x256xf32>
    %91 = arith.negf %90 : vector<8x256xf32>
    %92 = math.exp %91 : vector<8x256xf32>
    %cst_34 = arith.constant 1.000000e+00 : f32
    %93 = vector.broadcast %cst_34 : f32 to vector<8x256xf32>
    %94 = arith.addf %93, %92 : vector<8x256xf32>
    %95 = arith.divf %93, %94 : vector<8x256xf32>
    %96 = vector.extract_strided_slice %90 {offsets = [0, 128], sizes = [8, 64], strides = [1, 1]} : vector<8x256xf32> to vector<8x64xf32>
    %97 = math.tanh %96 : vector<8x64xf32>
    %98 = vector.extract_strided_slice %95 {offsets = [0, 64], sizes = [8, 64], strides = [1, 1]} : vector<8x256xf32> to vector<8x64xf32>
    %99 = arith.mulf %98, %84 : vector<8x64xf32>
    %100 = vector.extract_strided_slice %95 {offsets = [0, 0], sizes = [8, 64], strides = [1, 1]} : vector<8x256xf32> to vector<8x64xf32>
    %101 = arith.mulf %100, %97 : vector<8x64xf32>
    %102 = arith.addf %99, %101 : vector<8x64xf32>
    %103 = vector.extract_strided_slice %95 {offsets = [0, 192], sizes = [8, 64], strides = [1, 1]} : vector<8x256xf32> to vector<8x64xf32>
    %104 = math.tanh %102 : vector<8x64xf32>
    %105 = arith.mulf %103, %104 : vector<8x64xf32>
    %cst_35 = arith.constant dense<0.000000e+00> : vector<8x256xf32>
    %106 = tpu.matmul %105, %15, %cst_35 {dimension_numbers = #tpu.dot_dimension_numbers<[1], [0], [0], [1], [0, 0, 1, 1], [], []>} : vector<8x64xf32>, vector<64x256xf32>, vector<8x256xf32> -> vector<8x256xf32>
    %c40 = arith.constant 40 : index
    %c0_36 = arith.constant 0 : index
    %107 = vector.load %arg11[%c40, %c0_36] : memref<64x256xf32, #tpu.memory_space<vmem>>, vector<8x256xf32>
    %108 = arith.addf %107, %106 : vector<8x256xf32>
    %109 = arith.negf %108 : vector<8x256xf32>
    %110 = math.exp %109 : vector<8x256xf32>
    %cst_37 = arith.constant 1.000000e+00 : f32
    %111 = vector.broadcast %cst_37 : f32 to vector<8x256xf32>
    %112 = arith.addf %111, %110 : vector<8x256xf32>
    %113 = arith.divf %111, %112 : vector<8x256xf32>
    %114 = vector.extract_strided_slice %108 {offsets = [0, 128], sizes = [8, 64], strides = [1, 1]} : vector<8x256xf32> to vector<8x64xf32>
    %115 = math.tanh %114 : vector<8x64xf32>
    %116 = vector.extract_strided_slice %113 {offsets = [0, 64], sizes = [8, 64], strides = [1, 1]} : vector<8x256xf32> to vector<8x64xf32>
    %117 = arith.mulf %116, %102 : vector<8x64xf32>
    %118 = vector.extract_strided_slice %113 {offsets = [0, 0], sizes = [8, 64], strides = [1, 1]} : vector<8x256xf32> to vector<8x64xf32>
    %119 = arith.mulf %118, %115 : vector<8x64xf32>
    %120 = arith.addf %117, %119 : vector<8x64xf32>
    %121 = vector.extract_strided_slice %113 {offsets = [0, 192], sizes = [8, 64], strides = [1, 1]} : vector<8x256xf32> to vector<8x64xf32>
    %122 = math.tanh %120 : vector<8x64xf32>
    %123 = arith.mulf %121, %122 : vector<8x64xf32>
    %cst_38 = arith.constant dense<0.000000e+00> : vector<8x256xf32>
    %124 = tpu.matmul %123, %15, %cst_38 {dimension_numbers = #tpu.dot_dimension_numbers<[1], [0], [0], [1], [0, 0, 1, 1], [], []>} : vector<8x64xf32>, vector<64x256xf32>, vector<8x256xf32> -> vector<8x256xf32>
    %c48 = arith.constant 48 : index
    %c0_39 = arith.constant 0 : index
    %125 = vector.load %arg11[%c48, %c0_39] : memref<64x256xf32, #tpu.memory_space<vmem>>, vector<8x256xf32>
    %126 = arith.addf %125, %124 : vector<8x256xf32>
    %127 = arith.negf %126 : vector<8x256xf32>
    %128 = math.exp %127 : vector<8x256xf32>
    %cst_40 = arith.constant 1.000000e+00 : f32
    %129 = vector.broadcast %cst_40 : f32 to vector<8x256xf32>
    %130 = arith.addf %129, %128 : vector<8x256xf32>
    %131 = arith.divf %129, %130 : vector<8x256xf32>
    %132 = vector.extract_strided_slice %126 {offsets = [0, 128], sizes = [8, 64], strides = [1, 1]} : vector<8x256xf32> to vector<8x64xf32>
    %133 = math.tanh %132 : vector<8x64xf32>
    %134 = vector.extract_strided_slice %131 {offsets = [0, 64], sizes = [8, 64], strides = [1, 1]} : vector<8x256xf32> to vector<8x64xf32>
    %135 = arith.mulf %134, %120 : vector<8x64xf32>
    %136 = vector.extract_strided_slice %131 {offsets = [0, 0], sizes = [8, 64], strides = [1, 1]} : vector<8x256xf32> to vector<8x64xf32>
    %137 = arith.mulf %136, %133 : vector<8x64xf32>
    %138 = arith.addf %135, %137 : vector<8x64xf32>
    %139 = vector.extract_strided_slice %131 {offsets = [0, 192], sizes = [8, 64], strides = [1, 1]} : vector<8x256xf32> to vector<8x64xf32>
    %140 = math.tanh %138 : vector<8x64xf32>
    %141 = arith.mulf %139, %140 : vector<8x64xf32>
    %cst_41 = arith.constant dense<0.000000e+00> : vector<8x256xf32>
    %142 = tpu.matmul %141, %15, %cst_41 {dimension_numbers = #tpu.dot_dimension_numbers<[1], [0], [0], [1], [0, 0, 1, 1], [], []>} : vector<8x64xf32>, vector<64x256xf32>, vector<8x256xf32> -> vector<8x256xf32>
    %c56 = arith.constant 56 : index
    %c0_42 = arith.constant 0 : index
    %143 = vector.load %arg11[%c56, %c0_42] : memref<64x256xf32, #tpu.memory_space<vmem>>, vector<8x256xf32>
    %144 = arith.addf %143, %142 : vector<8x256xf32>
    %145 = arith.negf %144 : vector<8x256xf32>
    %146 = math.exp %145 : vector<8x256xf32>
    %cst_43 = arith.constant 1.000000e+00 : f32
    %147 = vector.broadcast %cst_43 : f32 to vector<8x256xf32>
    %148 = arith.addf %147, %146 : vector<8x256xf32>
    %149 = arith.divf %147, %148 : vector<8x256xf32>
    %150 = vector.extract_strided_slice %144 {offsets = [0, 128], sizes = [8, 64], strides = [1, 1]} : vector<8x256xf32> to vector<8x64xf32>
    %151 = math.tanh %150 : vector<8x64xf32>
    %152 = vector.extract_strided_slice %149 {offsets = [0, 64], sizes = [8, 64], strides = [1, 1]} : vector<8x256xf32> to vector<8x64xf32>
    %153 = arith.mulf %152, %138 : vector<8x64xf32>
    %154 = vector.extract_strided_slice %149 {offsets = [0, 0], sizes = [8, 64], strides = [1, 1]} : vector<8x256xf32> to vector<8x64xf32>
    %155 = arith.mulf %154, %151 : vector<8x64xf32>
    %156 = arith.addf %153, %155 : vector<8x64xf32>
    %157 = vector.extract_strided_slice %149 {offsets = [0, 192], sizes = [8, 64], strides = [1, 1]} : vector<8x256xf32> to vector<8x64xf32>
    %158 = math.tanh %156 : vector<8x64xf32>
    %159 = arith.mulf %157, %158 : vector<8x64xf32>
    %c0_44 = arith.constant 0 : index
    %c0_45 = arith.constant 0 : index
    %160 = vector.load %arg6[%c0_44, %c0_45] : memref<64x256xf32, #tpu.memory_space<vmem>>, vector<64x256xf32>
    %cst_46 = arith.constant dense<0.000000e+00> : vector<8x256xf32>
    %161 = tpu.matmul %159, %160, %cst_46 {dimension_numbers = #tpu.dot_dimension_numbers<[1], [0], [0], [1], [0, 0, 1, 1], [], []>} : vector<8x64xf32>, vector<64x256xf32>, vector<8x256xf32> -> vector<8x256xf32>
    %c0_47 = arith.constant 0 : index
    %c0_48 = arith.constant 0 : index
    %162 = vector.load %arg12[%c0_47, %c0_48] : memref<128x256xf32, #tpu.memory_space<vmem>>, vector<8x256xf32>
    %163 = arith.addf %162, %161 : vector<8x256xf32>
    %164 = arith.negf %163 : vector<8x256xf32>
    %165 = math.exp %164 : vector<8x256xf32>
    %cst_49 = arith.constant 1.000000e+00 : f32
    %166 = vector.broadcast %cst_49 : f32 to vector<8x256xf32>
    %167 = arith.addf %166, %165 : vector<8x256xf32>
    %168 = arith.divf %166, %167 : vector<8x256xf32>
    %169 = vector.extract_strided_slice %163 {offsets = [0, 128], sizes = [8, 64], strides = [1, 1]} : vector<8x256xf32> to vector<8x64xf32>
    %170 = math.tanh %169 : vector<8x64xf32>
    %171 = vector.extract_strided_slice %168 {offsets = [0, 64], sizes = [8, 64], strides = [1, 1]} : vector<8x256xf32> to vector<8x64xf32>
    %172 = arith.mulf %171, %156 : vector<8x64xf32>
    %173 = vector.extract_strided_slice %168 {offsets = [0, 0], sizes = [8, 64], strides = [1, 1]} : vector<8x256xf32> to vector<8x64xf32>
    %174 = arith.mulf %173, %170 : vector<8x64xf32>
    %175 = arith.addf %172, %174 : vector<8x64xf32>
    %176 = vector.extract_strided_slice %168 {offsets = [0, 192], sizes = [8, 64], strides = [1, 1]} : vector<8x256xf32> to vector<8x64xf32>
    %177 = math.tanh %175 : vector<8x64xf32>
    %178 = arith.mulf %176, %177 : vector<8x64xf32>
    %cst_50 = arith.constant dense<0.000000e+00> : vector<8x256xf32>
    %179 = tpu.matmul %178, %160, %cst_50 {dimension_numbers = #tpu.dot_dimension_numbers<[1], [0], [0], [1], [0, 0, 1, 1], [], []>} : vector<8x64xf32>, vector<64x256xf32>, vector<8x256xf32> -> vector<8x256xf32>
    %c8_51 = arith.constant 8 : index
    %c0_52 = arith.constant 0 : index
    %180 = vector.load %arg12[%c8_51, %c0_52] : memref<128x256xf32, #tpu.memory_space<vmem>>, vector<8x256xf32>
    %181 = arith.addf %180, %179 : vector<8x256xf32>
    %182 = arith.negf %181 : vector<8x256xf32>
    %183 = math.exp %182 : vector<8x256xf32>
    %cst_53 = arith.constant 1.000000e+00 : f32
    %184 = vector.broadcast %cst_53 : f32 to vector<8x256xf32>
    %185 = arith.addf %184, %183 : vector<8x256xf32>
    %186 = arith.divf %184, %185 : vector<8x256xf32>
    %187 = vector.extract_strided_slice %181 {offsets = [0, 128], sizes = [8, 64], strides = [1, 1]} : vector<8x256xf32> to vector<8x64xf32>
    %188 = math.tanh %187 : vector<8x64xf32>
    %189 = vector.extract_strided_slice %186 {offsets = [0, 64], sizes = [8, 64], strides = [1, 1]} : vector<8x256xf32> to vector<8x64xf32>
    %190 = arith.mulf %189, %175 : vector<8x64xf32>
    %191 = vector.extract_strided_slice %186 {offsets = [0, 0], sizes = [8, 64], strides = [1, 1]} : vector<8x256xf32> to vector<8x64xf32>
    %192 = arith.mulf %191, %188 : vector<8x64xf32>
    %193 = arith.addf %190, %192 : vector<8x64xf32>
    %194 = vector.extract_strided_slice %186 {offsets = [0, 192], sizes = [8, 64], strides = [1, 1]} : vector<8x256xf32> to vector<8x64xf32>
    %195 = math.tanh %193 : vector<8x64xf32>
    %196 = arith.mulf %194, %195 : vector<8x64xf32>
    %cst_54 = arith.constant dense<0.000000e+00> : vector<8x256xf32>
    %197 = tpu.matmul %196, %160, %cst_54 {dimension_numbers = #tpu.dot_dimension_numbers<[1], [0], [0], [1], [0, 0, 1, 1], [], []>} : vector<8x64xf32>, vector<64x256xf32>, vector<8x256xf32> -> vector<8x256xf32>
    %c16_55 = arith.constant 16 : index
    %c0_56 = arith.constant 0 : index
    %198 = vector.load %arg12[%c16_55, %c0_56] : memref<128x256xf32, #tpu.memory_space<vmem>>, vector<8x256xf32>
    %199 = arith.addf %198, %197 : vector<8x256xf32>
    %200 = arith.negf %199 : vector<8x256xf32>
    %201 = math.exp %200 : vector<8x256xf32>
    %cst_57 = arith.constant 1.000000e+00 : f32
    %202 = vector.broadcast %cst_57 : f32 to vector<8x256xf32>
    %203 = arith.addf %202, %201 : vector<8x256xf32>
    %204 = arith.divf %202, %203 : vector<8x256xf32>
    %205 = vector.extract_strided_slice %199 {offsets = [0, 128], sizes = [8, 64], strides = [1, 1]} : vector<8x256xf32> to vector<8x64xf32>
    %206 = math.tanh %205 : vector<8x64xf32>
    %207 = vector.extract_strided_slice %204 {offsets = [0, 64], sizes = [8, 64], strides = [1, 1]} : vector<8x256xf32> to vector<8x64xf32>
    %208 = arith.mulf %207, %193 : vector<8x64xf32>
    %209 = vector.extract_strided_slice %204 {offsets = [0, 0], sizes = [8, 64], strides = [1, 1]} : vector<8x256xf32> to vector<8x64xf32>
    %210 = arith.mulf %209, %206 : vector<8x64xf32>
    %211 = arith.addf %208, %210 : vector<8x64xf32>
    %212 = vector.extract_strided_slice %204 {offsets = [0, 192], sizes = [8, 64], strides = [1, 1]} : vector<8x256xf32> to vector<8x64xf32>
    %213 = math.tanh %211 : vector<8x64xf32>
    %214 = arith.mulf %212, %213 : vector<8x64xf32>
    %cst_58 = arith.constant dense<0.000000e+00> : vector<8x256xf32>
    %215 = tpu.matmul %214, %160, %cst_58 {dimension_numbers = #tpu.dot_dimension_numbers<[1], [0], [0], [1], [0, 0, 1, 1], [], []>} : vector<8x64xf32>, vector<64x256xf32>, vector<8x256xf32> -> vector<8x256xf32>
    %c24_59 = arith.constant 24 : index
    %c0_60 = arith.constant 0 : index
    %216 = vector.load %arg12[%c24_59, %c0_60] : memref<128x256xf32, #tpu.memory_space<vmem>>, vector<8x256xf32>
    %217 = arith.addf %216, %215 : vector<8x256xf32>
    %218 = arith.negf %217 : vector<8x256xf32>
    %219 = math.exp %218 : vector<8x256xf32>
    %cst_61 = arith.constant 1.000000e+00 : f32
    %220 = vector.broadcast %cst_61 : f32 to vector<8x256xf32>
    %221 = arith.addf %220, %219 : vector<8x256xf32>
    %222 = arith.divf %220, %221 : vector<8x256xf32>
    %223 = vector.extract_strided_slice %217 {offsets = [0, 128], sizes = [8, 64], strides = [1, 1]} : vector<8x256xf32> to vector<8x64xf32>
    %224 = math.tanh %223 : vector<8x64xf32>
    %225 = vector.extract_strided_slice %222 {offsets = [0, 64], sizes = [8, 64], strides = [1, 1]} : vector<8x256xf32> to vector<8x64xf32>
    %226 = arith.mulf %225, %211 : vector<8x64xf32>
    %227 = vector.extract_strided_slice %222 {offsets = [0, 0], sizes = [8, 64], strides = [1, 1]} : vector<8x256xf32> to vector<8x64xf32>
    %228 = arith.mulf %227, %224 : vector<8x64xf32>
    %229 = arith.addf %226, %228 : vector<8x64xf32>
    %230 = vector.extract_strided_slice %222 {offsets = [0, 192], sizes = [8, 64], strides = [1, 1]} : vector<8x256xf32> to vector<8x64xf32>
    %231 = math.tanh %229 : vector<8x64xf32>
    %232 = arith.mulf %230, %231 : vector<8x64xf32>
    %cst_62 = arith.constant dense<0.000000e+00> : vector<8x256xf32>
    %233 = tpu.matmul %232, %160, %cst_62 {dimension_numbers = #tpu.dot_dimension_numbers<[1], [0], [0], [1], [0, 0, 1, 1], [], []>} : vector<8x64xf32>, vector<64x256xf32>, vector<8x256xf32> -> vector<8x256xf32>
    %c32_63 = arith.constant 32 : index
    %c0_64 = arith.constant 0 : index
    %234 = vector.load %arg12[%c32_63, %c0_64] : memref<128x256xf32, #tpu.memory_space<vmem>>, vector<8x256xf32>
    %235 = arith.addf %234, %233 : vector<8x256xf32>
    %236 = arith.negf %235 : vector<8x256xf32>
    %237 = math.exp %236 : vector<8x256xf32>
    %cst_65 = arith.constant 1.000000e+00 : f32
    %238 = vector.broadcast %cst_65 : f32 to vector<8x256xf32>
    %239 = arith.addf %238, %237 : vector<8x256xf32>
    %240 = arith.divf %238, %239 : vector<8x256xf32>
    %241 = vector.extract_strided_slice %235 {offsets = [0, 128], sizes = [8, 64], strides = [1, 1]} : vector<8x256xf32> to vector<8x64xf32>
    %242 = math.tanh %241 : vector<8x64xf32>
    %243 = vector.extract_strided_slice %240 {offsets = [0, 64], sizes = [8, 64], strides = [1, 1]} : vector<8x256xf32> to vector<8x64xf32>
    %244 = arith.mulf %243, %229 : vector<8x64xf32>
    %245 = vector.extract_strided_slice %240 {offsets = [0, 0], sizes = [8, 64], strides = [1, 1]} : vector<8x256xf32> to vector<8x64xf32>
    %246 = arith.mulf %245, %242 : vector<8x64xf32>
    %247 = arith.addf %244, %246 : vector<8x64xf32>
    %248 = vector.extract_strided_slice %240 {offsets = [0, 192], sizes = [8, 64], strides = [1, 1]} : vector<8x256xf32> to vector<8x64xf32>
    %249 = math.tanh %247 : vector<8x64xf32>
    %250 = arith.mulf %248, %249 : vector<8x64xf32>
    %cst_66 = arith.constant dense<0.000000e+00> : vector<8x256xf32>
    %251 = tpu.matmul %250, %160, %cst_66 {dimension_numbers = #tpu.dot_dimension_numbers<[1], [0], [0], [1], [0, 0, 1, 1], [], []>} : vector<8x64xf32>, vector<64x256xf32>, vector<8x256xf32> -> vector<8x256xf32>
    %c40_67 = arith.constant 40 : index
    %c0_68 = arith.constant 0 : index
    %252 = vector.load %arg12[%c40_67, %c0_68] : memref<128x256xf32, #tpu.memory_space<vmem>>, vector<8x256xf32>
    %253 = arith.addf %252, %251 : vector<8x256xf32>
    %254 = arith.negf %253 : vector<8x256xf32>
    %255 = math.exp %254 : vector<8x256xf32>
    %cst_69 = arith.constant 1.000000e+00 : f32
    %256 = vector.broadcast %cst_69 : f32 to vector<8x256xf32>
    %257 = arith.addf %256, %255 : vector<8x256xf32>
    %258 = arith.divf %256, %257 : vector<8x256xf32>
    %259 = vector.extract_strided_slice %253 {offsets = [0, 128], sizes = [8, 64], strides = [1, 1]} : vector<8x256xf32> to vector<8x64xf32>
    %260 = math.tanh %259 : vector<8x64xf32>
    %261 = vector.extract_strided_slice %258 {offsets = [0, 64], sizes = [8, 64], strides = [1, 1]} : vector<8x256xf32> to vector<8x64xf32>
    %262 = arith.mulf %261, %247 : vector<8x64xf32>
    %263 = vector.extract_strided_slice %258 {offsets = [0, 0], sizes = [8, 64], strides = [1, 1]} : vector<8x256xf32> to vector<8x64xf32>
    %264 = arith.mulf %263, %260 : vector<8x64xf32>
    %265 = arith.addf %262, %264 : vector<8x64xf32>
    %266 = vector.extract_strided_slice %258 {offsets = [0, 192], sizes = [8, 64], strides = [1, 1]} : vector<8x256xf32> to vector<8x64xf32>
    %267 = math.tanh %265 : vector<8x64xf32>
    %268 = arith.mulf %266, %267 : vector<8x64xf32>
    %cst_70 = arith.constant dense<0.000000e+00> : vector<8x256xf32>
    %269 = tpu.matmul %268, %160, %cst_70 {dimension_numbers = #tpu.dot_dimension_numbers<[1], [0], [0], [1], [0, 0, 1, 1], [], []>} : vector<8x64xf32>, vector<64x256xf32>, vector<8x256xf32> -> vector<8x256xf32>
    %c48_71 = arith.constant 48 : index
    %c0_72 = arith.constant 0 : index
    %270 = vector.load %arg12[%c48_71, %c0_72] : memref<128x256xf32, #tpu.memory_space<vmem>>, vector<8x256xf32>
    %271 = arith.addf %270, %269 : vector<8x256xf32>
    %272 = arith.negf %271 : vector<8x256xf32>
    %273 = math.exp %272 : vector<8x256xf32>
    %cst_73 = arith.constant 1.000000e+00 : f32
    %274 = vector.broadcast %cst_73 : f32 to vector<8x256xf32>
    %275 = arith.addf %274, %273 : vector<8x256xf32>
    %276 = arith.divf %274, %275 : vector<8x256xf32>
    %277 = vector.extract_strided_slice %271 {offsets = [0, 128], sizes = [8, 64], strides = [1, 1]} : vector<8x256xf32> to vector<8x64xf32>
    %278 = math.tanh %277 : vector<8x64xf32>
    %279 = vector.extract_strided_slice %276 {offsets = [0, 64], sizes = [8, 64], strides = [1, 1]} : vector<8x256xf32> to vector<8x64xf32>
    %280 = arith.mulf %279, %265 : vector<8x64xf32>
    %281 = vector.extract_strided_slice %276 {offsets = [0, 0], sizes = [8, 64], strides = [1, 1]} : vector<8x256xf32> to vector<8x64xf32>
    %282 = arith.mulf %281, %278 : vector<8x64xf32>
    %283 = arith.addf %280, %282 : vector<8x64xf32>
    %284 = vector.extract_strided_slice %276 {offsets = [0, 192], sizes = [8, 64], strides = [1, 1]} : vector<8x256xf32> to vector<8x64xf32>
    %285 = math.tanh %283 : vector<8x64xf32>
    %286 = arith.mulf %284, %285 : vector<8x64xf32>
    %cst_74 = arith.constant dense<0.000000e+00> : vector<8x256xf32>
    %287 = tpu.matmul %286, %160, %cst_74 {dimension_numbers = #tpu.dot_dimension_numbers<[1], [0], [0], [1], [0, 0, 1, 1], [], []>} : vector<8x64xf32>, vector<64x256xf32>, vector<8x256xf32> -> vector<8x256xf32>
    %c56_75 = arith.constant 56 : index
    %c0_76 = arith.constant 0 : index
    %288 = vector.load %arg12[%c56_75, %c0_76] : memref<128x256xf32, #tpu.memory_space<vmem>>, vector<8x256xf32>
    %289 = arith.addf %288, %287 : vector<8x256xf32>
    %290 = arith.negf %289 : vector<8x256xf32>
    %291 = math.exp %290 : vector<8x256xf32>
    %cst_77 = arith.constant 1.000000e+00 : f32
    %292 = vector.broadcast %cst_77 : f32 to vector<8x256xf32>
    %293 = arith.addf %292, %291 : vector<8x256xf32>
    %294 = arith.divf %292, %293 : vector<8x256xf32>
    %295 = vector.extract_strided_slice %289 {offsets = [0, 128], sizes = [8, 64], strides = [1, 1]} : vector<8x256xf32> to vector<8x64xf32>
    %296 = math.tanh %295 : vector<8x64xf32>
    %297 = vector.extract_strided_slice %294 {offsets = [0, 64], sizes = [8, 64], strides = [1, 1]} : vector<8x256xf32> to vector<8x64xf32>
    %298 = arith.mulf %297, %283 : vector<8x64xf32>
    %299 = vector.extract_strided_slice %294 {offsets = [0, 0], sizes = [8, 64], strides = [1, 1]} : vector<8x256xf32> to vector<8x64xf32>
    %300 = arith.mulf %299, %296 : vector<8x64xf32>
    %301 = arith.addf %298, %300 : vector<8x64xf32>
    %302 = vector.extract_strided_slice %294 {offsets = [0, 192], sizes = [8, 64], strides = [1, 1]} : vector<8x256xf32> to vector<8x64xf32>
    %303 = math.tanh %301 : vector<8x64xf32>
    %304 = arith.mulf %302, %303 : vector<8x64xf32>
    %cst_78 = arith.constant dense<0.000000e+00> : vector<8x256xf32>
    %305 = tpu.matmul %304, %160, %cst_78 {dimension_numbers = #tpu.dot_dimension_numbers<[1], [0], [0], [1], [0, 0, 1, 1], [], []>} : vector<8x64xf32>, vector<64x256xf32>, vector<8x256xf32> -> vector<8x256xf32>
    %c64 = arith.constant 64 : index
    %c0_79 = arith.constant 0 : index
    %306 = vector.load %arg12[%c64, %c0_79] : memref<128x256xf32, #tpu.memory_space<vmem>>, vector<8x256xf32>
    %307 = arith.addf %306, %305 : vector<8x256xf32>
    %308 = arith.negf %307 : vector<8x256xf32>
    %309 = math.exp %308 : vector<8x256xf32>
    %cst_80 = arith.constant 1.000000e+00 : f32
    %310 = vector.broadcast %cst_80 : f32 to vector<8x256xf32>
    %311 = arith.addf %310, %309 : vector<8x256xf32>
    %312 = arith.divf %310, %311 : vector<8x256xf32>
    %313 = vector.extract_strided_slice %307 {offsets = [0, 128], sizes = [8, 64], strides = [1, 1]} : vector<8x256xf32> to vector<8x64xf32>
    %314 = math.tanh %313 : vector<8x64xf32>
    %315 = vector.extract_strided_slice %312 {offsets = [0, 64], sizes = [8, 64], strides = [1, 1]} : vector<8x256xf32> to vector<8x64xf32>
    %316 = arith.mulf %315, %301 : vector<8x64xf32>
    %317 = vector.extract_strided_slice %312 {offsets = [0, 0], sizes = [8, 64], strides = [1, 1]} : vector<8x256xf32> to vector<8x64xf32>
    %318 = arith.mulf %317, %314 : vector<8x64xf32>
    %319 = arith.addf %316, %318 : vector<8x64xf32>
    %320 = vector.extract_strided_slice %312 {offsets = [0, 192], sizes = [8, 64], strides = [1, 1]} : vector<8x256xf32> to vector<8x64xf32>
    %321 = math.tanh %319 : vector<8x64xf32>
    %322 = arith.mulf %320, %321 : vector<8x64xf32>
    %cst_81 = arith.constant dense<0.000000e+00> : vector<8x256xf32>
    %323 = tpu.matmul %322, %160, %cst_81 {dimension_numbers = #tpu.dot_dimension_numbers<[1], [0], [0], [1], [0, 0, 1, 1], [], []>} : vector<8x64xf32>, vector<64x256xf32>, vector<8x256xf32> -> vector<8x256xf32>
    %c72 = arith.constant 72 : index
    %c0_82 = arith.constant 0 : index
    %324 = vector.load %arg12[%c72, %c0_82] : memref<128x256xf32, #tpu.memory_space<vmem>>, vector<8x256xf32>
    %325 = arith.addf %324, %323 : vector<8x256xf32>
    %326 = arith.negf %325 : vector<8x256xf32>
    %327 = math.exp %326 : vector<8x256xf32>
    %cst_83 = arith.constant 1.000000e+00 : f32
    %328 = vector.broadcast %cst_83 : f32 to vector<8x256xf32>
    %329 = arith.addf %328, %327 : vector<8x256xf32>
    %330 = arith.divf %328, %329 : vector<8x256xf32>
    %331 = vector.extract_strided_slice %325 {offsets = [0, 128], sizes = [8, 64], strides = [1, 1]} : vector<8x256xf32> to vector<8x64xf32>
    %332 = math.tanh %331 : vector<8x64xf32>
    %333 = vector.extract_strided_slice %330 {offsets = [0, 64], sizes = [8, 64], strides = [1, 1]} : vector<8x256xf32> to vector<8x64xf32>
    %334 = arith.mulf %333, %319 : vector<8x64xf32>
    %335 = vector.extract_strided_slice %330 {offsets = [0, 0], sizes = [8, 64], strides = [1, 1]} : vector<8x256xf32> to vector<8x64xf32>
    %336 = arith.mulf %335, %332 : vector<8x64xf32>
    %337 = arith.addf %334, %336 : vector<8x64xf32>
    %338 = vector.extract_strided_slice %330 {offsets = [0, 192], sizes = [8, 64], strides = [1, 1]} : vector<8x256xf32> to vector<8x64xf32>
    %339 = math.tanh %337 : vector<8x64xf32>
    %340 = arith.mulf %338, %339 : vector<8x64xf32>
    %cst_84 = arith.constant dense<0.000000e+00> : vector<8x256xf32>
    %341 = tpu.matmul %340, %160, %cst_84 {dimension_numbers = #tpu.dot_dimension_numbers<[1], [0], [0], [1], [0, 0, 1, 1], [], []>} : vector<8x64xf32>, vector<64x256xf32>, vector<8x256xf32> -> vector<8x256xf32>
    %c80 = arith.constant 80 : index
    %c0_85 = arith.constant 0 : index
    %342 = vector.load %arg12[%c80, %c0_85] : memref<128x256xf32, #tpu.memory_space<vmem>>, vector<8x256xf32>
    %343 = arith.addf %342, %341 : vector<8x256xf32>
    %344 = arith.negf %343 : vector<8x256xf32>
    %345 = math.exp %344 : vector<8x256xf32>
    %cst_86 = arith.constant 1.000000e+00 : f32
    %346 = vector.broadcast %cst_86 : f32 to vector<8x256xf32>
    %347 = arith.addf %346, %345 : vector<8x256xf32>
    %348 = arith.divf %346, %347 : vector<8x256xf32>
    %349 = vector.extract_strided_slice %343 {offsets = [0, 128], sizes = [8, 64], strides = [1, 1]} : vector<8x256xf32> to vector<8x64xf32>
    %350 = math.tanh %349 : vector<8x64xf32>
    %351 = vector.extract_strided_slice %348 {offsets = [0, 64], sizes = [8, 64], strides = [1, 1]} : vector<8x256xf32> to vector<8x64xf32>
    %352 = arith.mulf %351, %337 : vector<8x64xf32>
    %353 = vector.extract_strided_slice %348 {offsets = [0, 0], sizes = [8, 64], strides = [1, 1]} : vector<8x256xf32> to vector<8x64xf32>
    %354 = arith.mulf %353, %350 : vector<8x64xf32>
    %355 = arith.addf %352, %354 : vector<8x64xf32>
    %356 = vector.extract_strided_slice %348 {offsets = [0, 192], sizes = [8, 64], strides = [1, 1]} : vector<8x256xf32> to vector<8x64xf32>
    %357 = math.tanh %355 : vector<8x64xf32>
    %358 = arith.mulf %356, %357 : vector<8x64xf32>
    %cst_87 = arith.constant dense<0.000000e+00> : vector<8x256xf32>
    %359 = tpu.matmul %358, %160, %cst_87 {dimension_numbers = #tpu.dot_dimension_numbers<[1], [0], [0], [1], [0, 0, 1, 1], [], []>} : vector<8x64xf32>, vector<64x256xf32>, vector<8x256xf32> -> vector<8x256xf32>
    %c88 = arith.constant 88 : index
    %c0_88 = arith.constant 0 : index
    %360 = vector.load %arg12[%c88, %c0_88] : memref<128x256xf32, #tpu.memory_space<vmem>>, vector<8x256xf32>
    %361 = arith.addf %360, %359 : vector<8x256xf32>
    %362 = arith.negf %361 : vector<8x256xf32>
    %363 = math.exp %362 : vector<8x256xf32>
    %cst_89 = arith.constant 1.000000e+00 : f32
    %364 = vector.broadcast %cst_89 : f32 to vector<8x256xf32>
    %365 = arith.addf %364, %363 : vector<8x256xf32>
    %366 = arith.divf %364, %365 : vector<8x256xf32>
    %367 = vector.extract_strided_slice %361 {offsets = [0, 128], sizes = [8, 64], strides = [1, 1]} : vector<8x256xf32> to vector<8x64xf32>
    %368 = math.tanh %367 : vector<8x64xf32>
    %369 = vector.extract_strided_slice %366 {offsets = [0, 64], sizes = [8, 64], strides = [1, 1]} : vector<8x256xf32> to vector<8x64xf32>
    %370 = arith.mulf %369, %355 : vector<8x64xf32>
    %371 = vector.extract_strided_slice %366 {offsets = [0, 0], sizes = [8, 64], strides = [1, 1]} : vector<8x256xf32> to vector<8x64xf32>
    %372 = arith.mulf %371, %368 : vector<8x64xf32>
    %373 = arith.addf %370, %372 : vector<8x64xf32>
    %374 = vector.extract_strided_slice %366 {offsets = [0, 192], sizes = [8, 64], strides = [1, 1]} : vector<8x256xf32> to vector<8x64xf32>
    %375 = math.tanh %373 : vector<8x64xf32>
    %376 = arith.mulf %374, %375 : vector<8x64xf32>
    %cst_90 = arith.constant dense<0.000000e+00> : vector<8x256xf32>
    %377 = tpu.matmul %376, %160, %cst_90 {dimension_numbers = #tpu.dot_dimension_numbers<[1], [0], [0], [1], [0, 0, 1, 1], [], []>} : vector<8x64xf32>, vector<64x256xf32>, vector<8x256xf32> -> vector<8x256xf32>
    %c96 = arith.constant 96 : index
    %c0_91 = arith.constant 0 : index
    %378 = vector.load %arg12[%c96, %c0_91] : memref<128x256xf32, #tpu.memory_space<vmem>>, vector<8x256xf32>
    %379 = arith.addf %378, %377 : vector<8x256xf32>
    %380 = arith.negf %379 : vector<8x256xf32>
    %381 = math.exp %380 : vector<8x256xf32>
    %cst_92 = arith.constant 1.000000e+00 : f32
    %382 = vector.broadcast %cst_92 : f32 to vector<8x256xf32>
    %383 = arith.addf %382, %381 : vector<8x256xf32>
    %384 = arith.divf %382, %383 : vector<8x256xf32>
    %385 = vector.extract_strided_slice %379 {offsets = [0, 128], sizes = [8, 64], strides = [1, 1]} : vector<8x256xf32> to vector<8x64xf32>
    %386 = math.tanh %385 : vector<8x64xf32>
    %387 = vector.extract_strided_slice %384 {offsets = [0, 64], sizes = [8, 64], strides = [1, 1]} : vector<8x256xf32> to vector<8x64xf32>
    %388 = arith.mulf %387, %373 : vector<8x64xf32>
    %389 = vector.extract_strided_slice %384 {offsets = [0, 0], sizes = [8, 64], strides = [1, 1]} : vector<8x256xf32> to vector<8x64xf32>
    %390 = arith.mulf %389, %386 : vector<8x64xf32>
    %391 = arith.addf %388, %390 : vector<8x64xf32>
    %392 = vector.extract_strided_slice %384 {offsets = [0, 192], sizes = [8, 64], strides = [1, 1]} : vector<8x256xf32> to vector<8x64xf32>
    %393 = math.tanh %391 : vector<8x64xf32>
    %394 = arith.mulf %392, %393 : vector<8x64xf32>
    %cst_93 = arith.constant dense<0.000000e+00> : vector<8x256xf32>
    %395 = tpu.matmul %394, %160, %cst_93 {dimension_numbers = #tpu.dot_dimension_numbers<[1], [0], [0], [1], [0, 0, 1, 1], [], []>} : vector<8x64xf32>, vector<64x256xf32>, vector<8x256xf32> -> vector<8x256xf32>
    %c104 = arith.constant 104 : index
    %c0_94 = arith.constant 0 : index
    %396 = vector.load %arg12[%c104, %c0_94] : memref<128x256xf32, #tpu.memory_space<vmem>>, vector<8x256xf32>
    %397 = arith.addf %396, %395 : vector<8x256xf32>
    %398 = arith.negf %397 : vector<8x256xf32>
    %399 = math.exp %398 : vector<8x256xf32>
    %cst_95 = arith.constant 1.000000e+00 : f32
    %400 = vector.broadcast %cst_95 : f32 to vector<8x256xf32>
    %401 = arith.addf %400, %399 : vector<8x256xf32>
    %402 = arith.divf %400, %401 : vector<8x256xf32>
    %403 = vector.extract_strided_slice %397 {offsets = [0, 128], sizes = [8, 64], strides = [1, 1]} : vector<8x256xf32> to vector<8x64xf32>
    %404 = math.tanh %403 : vector<8x64xf32>
    %405 = vector.extract_strided_slice %402 {offsets = [0, 64], sizes = [8, 64], strides = [1, 1]} : vector<8x256xf32> to vector<8x64xf32>
    %406 = arith.mulf %405, %391 : vector<8x64xf32>
    %407 = vector.extract_strided_slice %402 {offsets = [0, 0], sizes = [8, 64], strides = [1, 1]} : vector<8x256xf32> to vector<8x64xf32>
    %408 = arith.mulf %407, %404 : vector<8x64xf32>
    %409 = arith.addf %406, %408 : vector<8x64xf32>
    %410 = vector.extract_strided_slice %402 {offsets = [0, 192], sizes = [8, 64], strides = [1, 1]} : vector<8x256xf32> to vector<8x64xf32>
    %411 = math.tanh %409 : vector<8x64xf32>
    %412 = arith.mulf %410, %411 : vector<8x64xf32>
    %cst_96 = arith.constant dense<0.000000e+00> : vector<8x256xf32>
    %413 = tpu.matmul %412, %160, %cst_96 {dimension_numbers = #tpu.dot_dimension_numbers<[1], [0], [0], [1], [0, 0, 1, 1], [], []>} : vector<8x64xf32>, vector<64x256xf32>, vector<8x256xf32> -> vector<8x256xf32>
    %c112 = arith.constant 112 : index
    %c0_97 = arith.constant 0 : index
    %414 = vector.load %arg12[%c112, %c0_97] : memref<128x256xf32, #tpu.memory_space<vmem>>, vector<8x256xf32>
    %415 = arith.addf %414, %413 : vector<8x256xf32>
    %416 = arith.negf %415 : vector<8x256xf32>
    %417 = math.exp %416 : vector<8x256xf32>
    %cst_98 = arith.constant 1.000000e+00 : f32
    %418 = vector.broadcast %cst_98 : f32 to vector<8x256xf32>
    %419 = arith.addf %418, %417 : vector<8x256xf32>
    %420 = arith.divf %418, %419 : vector<8x256xf32>
    %421 = vector.extract_strided_slice %415 {offsets = [0, 128], sizes = [8, 64], strides = [1, 1]} : vector<8x256xf32> to vector<8x64xf32>
    %422 = math.tanh %421 : vector<8x64xf32>
    %423 = vector.extract_strided_slice %420 {offsets = [0, 64], sizes = [8, 64], strides = [1, 1]} : vector<8x256xf32> to vector<8x64xf32>
    %424 = arith.mulf %423, %409 : vector<8x64xf32>
    %425 = vector.extract_strided_slice %420 {offsets = [0, 0], sizes = [8, 64], strides = [1, 1]} : vector<8x256xf32> to vector<8x64xf32>
    %426 = arith.mulf %425, %422 : vector<8x64xf32>
    %427 = arith.addf %424, %426 : vector<8x64xf32>
    %428 = vector.extract_strided_slice %420 {offsets = [0, 192], sizes = [8, 64], strides = [1, 1]} : vector<8x256xf32> to vector<8x64xf32>
    %429 = math.tanh %427 : vector<8x64xf32>
    %430 = arith.mulf %428, %429 : vector<8x64xf32>
    %cst_99 = arith.constant dense<0.000000e+00> : vector<8x256xf32>
    %431 = tpu.matmul %430, %160, %cst_99 {dimension_numbers = #tpu.dot_dimension_numbers<[1], [0], [0], [1], [0, 0, 1, 1], [], []>} : vector<8x64xf32>, vector<64x256xf32>, vector<8x256xf32> -> vector<8x256xf32>
    %c120 = arith.constant 120 : index
    %c0_100 = arith.constant 0 : index
    %432 = vector.load %arg12[%c120, %c0_100] : memref<128x256xf32, #tpu.memory_space<vmem>>, vector<8x256xf32>
    %433 = arith.addf %432, %431 : vector<8x256xf32>
    %434 = arith.negf %433 : vector<8x256xf32>
    %435 = math.exp %434 : vector<8x256xf32>
    %cst_101 = arith.constant 1.000000e+00 : f32
    %436 = vector.broadcast %cst_101 : f32 to vector<8x256xf32>
    %437 = arith.addf %436, %435 : vector<8x256xf32>
    %438 = arith.divf %436, %437 : vector<8x256xf32>
    %439 = vector.extract_strided_slice %433 {offsets = [0, 128], sizes = [8, 64], strides = [1, 1]} : vector<8x256xf32> to vector<8x64xf32>
    %440 = math.tanh %439 : vector<8x64xf32>
    %441 = vector.extract_strided_slice %438 {offsets = [0, 64], sizes = [8, 64], strides = [1, 1]} : vector<8x256xf32> to vector<8x64xf32>
    %442 = arith.mulf %441, %427 : vector<8x64xf32>
    %443 = vector.extract_strided_slice %438 {offsets = [0, 0], sizes = [8, 64], strides = [1, 1]} : vector<8x256xf32> to vector<8x64xf32>
    %444 = arith.mulf %443, %440 : vector<8x64xf32>
    %445 = arith.addf %442, %444 : vector<8x64xf32>
    %446 = vector.extract_strided_slice %438 {offsets = [0, 192], sizes = [8, 64], strides = [1, 1]} : vector<8x256xf32> to vector<8x64xf32>
    %447 = math.tanh %445 : vector<8x64xf32>
    %448 = arith.mulf %446, %447 : vector<8x64xf32>
    %c0_102 = arith.constant 0 : index
    %c0_103 = arith.constant 0 : index
    %449 = vector.load %arg8[%c0_102, %c0_103] : memref<64x3xf32, #tpu.memory_space<vmem>>, vector<64x3xf32>
    %cst_104 = arith.constant dense<0.000000e+00> : vector<8x3xf32>
    %450 = tpu.matmul %448, %449, %cst_104 {dimension_numbers = #tpu.dot_dimension_numbers<[1], [0], [0], [1], [0, 0, 1, 1], [], []>} : vector<8x64xf32>, vector<64x3xf32>, vector<8x3xf32> -> vector<8x3xf32>
    %c0_105 = arith.constant 0 : index
    %c0_106 = arith.constant 0 : index
    %451 = vector.load %arg9[%c0_105, %c0_106] : memref<1x3xf32, #tpu.memory_space<vmem>>, vector<1x3xf32>
    %452 = vector.broadcast %451 : vector<1x3xf32> to vector<8x3xf32>
    %453 = arith.addf %450, %452 : vector<8x3xf32>
    %c0_107 = arith.constant 0 : index
    %c0_108 = arith.constant 0 : index
    %454 = vector.load %arg10[%c0_107, %c0_108] : memref<8x3xf32, #tpu.memory_space<vmem>>, vector<8x3xf32>
    tpu.vector_store %arg10[%c0_107, %c0_108], %453 {strides = array<i32>} : memref<8x3xf32, #tpu.memory_space<vmem>>, vector<8x3xf32>,
    return
  }
}

</mosaic_0001>

<bundles_post_ra>
// kernel: bicond_forward.1
= control target key start
LH: loop header
LB: loop body
LE: loop exit
PB: predicated region body
PF: predicated region fallthrough
CT: control target
= control target key end

     0   :  { %v4025_v3 = vmov 0.0   ;;  %vm71_vm0 = vcmask 523264   ;;  %vm4028_vm1 = vmmov 0   ;;  %vm3078_vm2 = vcmask 23552   ;;  %s4918_s2 = inlined_call_operand.vmem [shape: f32[64,256], index: 2, kind: input, shape index: {}]   ;;  %s4919_s5 = inlined_call_operand.vmem [shape: f32[64,256], index: 5, kind: input, shape index: {}]   ;;  %s4920_s0 = inlined_call_operand.vmem [shape: f32[64,64], index: 0, kind: input, shape index: {}]   ;;  %s4921_s3 = inlined_call_operand.vmem [shape: f32[64,256], index: 3, kind: input, shape index: {}]   ;;  %s4922_s1 = inlined_call_operand.vmem [shape: f32[128,64], index: 1, kind: input, shape index: {}]   ;;  %s4923_s7 = inlined_call_operand.vmem [shape: f32[1,256], index: 7, kind: input, shape index: {}]   ;;  %s4924_s4 = inlined_call_operand.vmem [shape: f32[1,256], index: 4, kind: input, shape index: {}]   ;;  %s4925_s6 = inlined_call_operand.vmem [shape: f32[64,256], index: 6, kind: input, shape index: {}]   ;;  %s4926_s8 = inlined_call_operand.vmem [shape: f32[64,3], index: 8, kind: input, shape index: {}]   ;;  %s4927_s9 = inlined_call_operand.vmem [shape: f32[1,3], index: 9, kind: input, shape index: {}]   ;;  %s4928_s10 = inlined_call_operand.vmem [shape: f32[8,3], index: 10, kind: output, shape index: {}]  }
   0x1   :  { %v44_v0 = vld [vmem:[%s4918_s2 + $0x8] sm:$0xff]  ;;  %v46_v1 = vld [vmem:[%s4918_s2 + $0x18] sm:$0xff]  ;;  %v43_v2 = vld [vmem:[%s4918_s2] sm:$0xff]  ;;  %160 = vmatprep.mubr.f32.mxu0 %v4025_v3  ;;  %1425 = vmatprep.mubr.f32.mxu1 %v4025_v3 }
   0x2   :  { %v3209_v4 = vpack.c.bf16 %v46_v1, %v44_v0  ;;  %v45_v5 = vld [vmem:[%s4918_s2 + $0x10] sm:$0xff]  ;;  %v48_v6 = vld [vmem:[%s4918_s2 + $0x28] sm:$0xff]  ;;  %v50_v7 = vld [vmem:[%s4918_s2 + $0x38] sm:$0xff] }
   0x3   :  { %v3211_v8 = vpack.c.bf16 %v45_v5, %v43_v2  ;;  %v3213_v9 = vpack.c.bf16 %v50_v7, %v48_v6  ;;  %v47_v10 = vld [vmem:[%s4918_s2 + $0x20] sm:$0xff]  ;;  %v49_v11 = vld [vmem:[%s4918_s2 + $0x30] sm:$0xff]  ;;  %v52_v12 = vld [vmem:[%s4918_s2 + $0x48] sm:$0xff] }
   0x4   :  { %3210 = vmatprep.subr.bf16.mxu0 %v3209_v4  ;;  %v54_v13 = vld [vmem:[%s4918_s2 + $0x58] sm:$0xff]  ;;  %v3215_v14 = vpack.c.bf16 %v49_v11, %v47_v10  ;;  %v51_v16 = vld [vmem:[%s4918_s2 + $0x40] sm:$0xff]  ;;  %v53_v17 = vld [vmem:[%s4918_s2 + $0x50] sm:$0xff] }
   0x5   :  { %3212 = vmatpush1.bf16.msra.mxu0 %v3211_v8  ;;  %v3217_v15 = vpack.c.bf16 %v54_v13, %v52_v12  ;;  %v56_v18 = vld [vmem:[%s4918_s2 + $0x68] sm:$0xff]  ;;  %v58_v19 = vld [vmem:[%s4918_s2 + $0x78] sm:$0xff]  ;;  %v3219_v20 = vpack.c.bf16 %v53_v17, %v51_v16  ;;  %v55_v22 = vld [vmem:[%s4918_s2 + $0x60] sm:$0xff] }
   0x6   :  { %3214 = vmatprep.subr.bf16.mxu0 %v3213_v9  ;;  %v3221_v21 = vpack.c.bf16 %v58_v19, %v56_v18  ;;  %v57_v23 = vld [vmem:[%s4918_s2 + $0x70] sm:$0xff]  ;;  %v242_v24 = vld [vmem:[%s4919_s5 + $0x8] sm:$0xff]  ;;  %v244_v25 = vld [vmem:[%s4919_s5 + $0x18] sm:$0xff] }
   0x7   :  { %v3223_v26 = vpack.c.bf16 %v57_v23, %v55_v22  ;;  %v3225_v27 = vpack.c.bf16 %v244_v25, %v242_v24  ;;  %v241_v28 = vld [vmem:[%s4919_s5] sm:$0xff]  ;;  %v243_v29 = vld [vmem:[%s4919_s5 + $0x10] sm:$0xff]  ;;  %v246_v30 = vld [vmem:[%s4919_s5 + $0x28] sm:$0xff] }
   0x8   :  { %v248_v31 = vld [vmem:[%s4919_s5 + $0x38] sm:$0xff]  ;;  %v35_v32 = vld [vmem:[%s4920_s0] sm:$0xff]  ;;  %v3227_v33 = vpack.c.bf16 %v243_v29, %v241_v28  ;;  %v247_v36 = vld [vmem:[%s4919_s5 + $0x30] sm:$0xff] }
   0x9   :  { %3216 = vmatpush1.bf16.msra.mxu0 %v3215_v14  ;;  %v3229_v34 = vpack.c.bf16 %v248_v31, %v246_v30  ;;  %v245_v35 = vld [vmem:[%s4919_s5 + $0x20] sm:$0xff]  ;;  %v250_v37 = vld [vmem:[%s4919_s5 + $0x48] sm:$0xff]  ;;  %v252_v38 = vld [vmem:[%s4919_s5 + $0x58] sm:$0xff] }
   0xa   :  { %3218 = vmatprep.subr.bf16.mxu0 %v3217_v15  ;;  %v36_v39 = vld [vmem:[%s4920_s0 + $0x8] sm:$0xff]  ;;  %v3231_v40 = vpack.c.bf16 %v247_v36, %v245_v35  ;;  %v3233_v41 = vpack.c.bf16 %v252_v38, %v250_v37  ;;  %v249_v42 = vld [vmem:[%s4919_s5 + $0x40] sm:$0xff]  ;;  %v251_v43 = vld [vmem:[%s4919_s5 + $0x50] sm:$0xff] }
   0xb   :  { %v254_v44 = vld [vmem:[%s4919_s5 + $0x68] sm:$0xff]  ;;  %v256_v45 = vld [vmem:[%s4919_s5 + $0x78] sm:$0xff]  ;;  %v37_v46 = vld [vmem:[%s4920_s0 + $0x10] sm:$0xff]  ;;  %v3235_v47 = vpack.c.bf16 %v251_v43, %v249_v42 }
   0xc   :  { %v3237_v48 = vpack.c.bf16 %v256_v45, %v254_v44  ;;  %v253_v49 = vld [vmem:[%s4919_s5 + $0x60] sm:$0xff]  ;;  %v255_v50 = vld [vmem:[%s4919_s5 + $0x70] sm:$0xff]  ;;  %v511_v51 = vld [vmem:[%s4921_s3 + $0x8] sm:$0xff] }
   0xd   :  { %3220 = vmatpush1.bf16.msra.mxu0 %v3219_v20  ;;  %v513_v52 = vld [vmem:[%s4921_s3 + $0x18] sm:$0xff]  ;;  %v3239_v54 = vpack.c.bf16 %v255_v50, %v253_v49  ;;  %v39_v56 = vld [vmem:[%s4920_s0 + $0x20] sm:$0xff]  ;;  %v40_v57 = vld [vmem:[%s4920_s0 + $0x28] sm:$0xff] }
   0xe   :  { %3222 = vmatprep.subr.bf16.mxu0 %v3221_v21  ;;  %v38_v53 = vld [vmem:[%s4920_s0 + $0x18] sm:$0xff]  ;;  %v4206_v55 = vpack.c.bf16 %v513_v52, %v511_v51  ;;  %v41_v58 = vld [vmem:[%s4920_s0 + $0x30] sm:$0xff]  ;;  %v510_v60 = vld [vmem:[%s4921_s3] sm:$0xff] }
   0xf   :  { %v42_v59 = vld [vmem:[%s4920_s0 + $0x38] sm:$0xff]  ;;  %v512_v61 = vld [vmem:[%s4921_s3 + $0x10] sm:$0xff]  ;;  %v515_v62 = vld [vmem:[%s4921_s3 + $0x28] sm:$0xff] }
  0x10   :  { %v517_v63 = vld [vmem:[%s4921_s3 + $0x38] sm:$0xff]  ;;  %v225_v0 = vld [vmem:[%s4922_s1] sm:$0xff]  ;;  %v4246_v1 = vpack.c.bf16 %v512_v61, %v510_v60  ;;  %v516_v5 = vld [vmem:[%s4921_s3 + $0x30] sm:$0xff] }
  0x11   :  { %3224 = vmatpush1.bf16.msra.mxu0 %v3223_v26  ;;  %v4248_v2 = vpack.c.bf16 %v517_v63, %v515_v62  ;;  %v514_v4 = vld [vmem:[%s4921_s3 + $0x20] sm:$0xff]  ;;  %v519_v6 = vld [vmem:[%s4921_s3 + $0x48] sm:$0xff]  ;;  %v521_v7 = vld [vmem:[%s4921_s3 + $0x58] sm:$0xff] }
  0x12   :  { %3226 = vmatprep.subr.bf16.mxu0 %v3225_v27  ;;  %v226_v8 = vld [vmem:[%s4922_s1 + $0x8] sm:$0xff]  ;;  %v4268_v9 = vpack.c.bf16 %v516_v5, %v514_v4  ;;  %v4271_v10 = vpack.c.bf16 %v521_v7, %v519_v6  ;;  %v518_v11 = vld [vmem:[%s4921_s3 + $0x40] sm:$0xff]  ;;  %v520_v12 = vld [vmem:[%s4921_s3 + $0x50] sm:$0xff] }
  0x13   :  { %v523_v13 = vld [vmem:[%s4921_s3 + $0x68] sm:$0xff]  ;;  %v525_v14 = vld [vmem:[%s4921_s3 + $0x78] sm:$0xff]  ;;  %v227_v15 = vld [vmem:[%s4922_s1 + $0x10] sm:$0xff]  ;;  %v4291_v16 = vpack.c.bf16 %v520_v12, %v518_v11 }
  0x14   :  { %3084 = vmatmul.mubr.msk.f32.vlgmr.msra.gmra.mrb[0].mxu0 %vm71_vm0, %v35_v32  ;;  %v4294_v17 = vpack.c.bf16 %v525_v14, %v523_v13  ;;  %v522_v18 = vld [vmem:[%s4921_s3 + $0x60] sm:$0xff]  ;;  %v524_v19 = vld [vmem:[%s4921_s3 + $0x70] sm:$0xff]  ;;  %v228_v20 = vld [vmem:[%s4922_s1 + $0x18] sm:$0xff] }
  0x15   :  { %3228 = vmatpush1.bf16.msra.mxu0 %v3227_v33  ;;  %166 = vmatprep.mubr.f32.mxu0 %v4025_v3  ;;  %v4308_v21 = vpack.c.bf16 %v524_v19, %v522_v18  ;;  %v229_v22 = vld [vmem:[%s4922_s1 + $0x20] sm:$0xff]  ;;  %v230_v23 = vld [vmem:[%s4922_s1 + $0x28] sm:$0xff]  ;;  %v231_v24 = vld [vmem:[%s4922_s1 + $0x30] sm:$0xff] }
  0x16   :  { %3230 = vmatprep.subr.bf16.mxu0 %v3229_v34  ;;  %v232_v25 = vld [vmem:[%s4922_s1 + $0x38] sm:$0xff]  ;;  %v233_v26 = vld [vmem:[%s4922_s1 + $0x40] sm:$0xff]  ;;  %v234_v27 = vld [vmem:[%s4922_s1 + $0x48] sm:$0xff]  ;;  %v61_v34 = vlaneseq }
  0x17   :  { %v235_v28 = vld [vmem:[%s4922_s1 + $0x50] sm:$0xff]  ;;  %v236_v29 = vld [vmem:[%s4922_s1 + $0x58] sm:$0xff]  ;;  %v237_v30 = vld [vmem:[%s4922_s1 + $0x60] sm:$0xff] }
  0x18   :  { %3085 = vmatmul.mubr.msk.f32.gmra.mrb[2].mxu0 %vm71_vm0, %v36_v39  ;;  %v238_v31 = vld [vmem:[%s4922_s1 + $0x68] sm:$0xff]  ;;  %v239_v32 = vld [vmem:[%s4922_s1 + $0x70] sm:$0xff]  ;;  %v240_v33 = vld [vmem:[%s4922_s1 + $0x78] sm:$0xff]  ;;  %v4385_v35 = vshrl.u32 %v61_v34, 7 }
  0x19   :  { %172 = vmatprep.mubr.f32.mxu0 %v4025_v3  ;;  %3232 = vmatpush1.bf16.msra.mxu0 %v3231_v40  ;;  %v257_v37 = vld [vmem:[%s4923_s7] sm:$0x3] }
  0x1a   :  { %3234 = vmatprep.subr.bf16.mxu0 %v3233_v41  ;;  %v67_v36 = vsub.s32 1, %v4385_v35  ;;  %v63_v39 = vsub.s32 0, %v4385_v35 }
  0x1c   :  { %3086 = vmatmul.mubr.msk.f32.gmra.mrb[4].mxu0 %vm71_vm0, %v37_v46  ;;  %v4393_v38 = vrot.slane %v257_v37, %v67_v36  ;;  %v4403_v43 = vrot.slane %v257_v37, %v63_v39 }
  0x1d   :  { %178 = vmatprep.mubr.f32.mxu0 %v4025_v3  ;;  %3236 = vmatpush1.bf16.msra.mxu0 %v3235_v47 }
  0x1e   :  { %3238 = vmatprep.subr.bf16.mxu0 %v3237_v48 }
  0x20   :  { %3087 = vmatmul.mubr.msk.f32.gmra.mrb[6].mxu0 %vm71_vm0, %v38_v53 }
  0x21   :  { %184 = vmatprep.mubr.f32.mxu0 %v4025_v3  ;;  %3240 = vmatpush1.bf16.msra.mxu0 %v3239_v54 }
  0x22   :  { %3242 = vmatprep.subr.bf16.mxu0 %v4206_v55 }
  0x24   :  { %3088 = vmatmul.mubr.msk.f32.gmra.mrb[8].mxu0 %vm71_vm0, %v39_v56 }
  0x25   :  { %190 = vmatprep.mubr.f32.mxu0 %v4025_v3 }
  0x28   :  { %3089 = vmatmul.mubr.msk.f32.gmra.mrb[10].mxu0 %vm71_vm0, %v40_v57 }
  0x29   :  { %196 = vmatprep.mubr.f32.mxu0 %v4025_v3 }
  0x2c   :  { %3090 = vmatmul.mubr.msk.f32.gmra.mrb[12].mxu0 %vm71_vm0, %v41_v58 }
  0x2d   :  { %202 = vmatprep.mubr.f32.mxu0 %v4025_v3 }
  0x30   :  { %3091 = vmatmul.mubr.msk.f32.gmra.mrb[14].mxu0 %vm71_vm0, %v42_v59 }
  0x31   :  { %381 = vmatprep.mubr.f32.mxu0 %v4025_v3 }
  0x34   :  { %3092 = vmatmul.mubr.msk.f32.vlgmr.msra.gmra.mrb[16].mxu0 %vm71_vm0, %v225_v0 }
  0x35   :  { %3244 = vmatpush1.bf16.msra.mxu0 %v4246_v1  ;;  %387 = vmatprep.mubr.f32.mxu0 %v4025_v3 }
  0x36   :  { %3246 = vmatprep.subr.bf16.mxu0 %v4248_v2 }
  0x38   :  { %3093 = vmatmul.mubr.msk.f32.gmra.mrb[18].mxu0 %vm71_vm0, %v226_v8 }
  0x39   :  { %393 = vmatprep.mubr.f32.mxu0 %v4025_v3  ;;  %3248 = vmatpush1.bf16.msra.mxu0 %v4268_v9 }
  0x3a   :  { %3250 = vmatprep.subr.bf16.mxu0 %v4271_v10 }
  0x3c   :  { %3094 = vmatmul.mubr.msk.f32.gmra.mrb[20].mxu0 %vm71_vm0, %v227_v15 }
  0x3d   :  { %399 = vmatprep.mubr.f32.mxu0 %v4025_v3  ;;  %3252 = vmatpush1.bf16.msra.mxu0 %v4291_v16 }
  0x3e   :  { %3254 = vmatprep.subr.bf16.mxu0 %v4294_v17 }
  0x40   :  { %3095 = vmatmul.mubr.msk.f32.gmra.mrb[22].mxu0 %vm71_vm0, %v228_v20 }
  0x41   :  { %405 = vmatprep.mubr.f32.mxu0 %v4025_v3  ;;  %3256 = vmatpush1.bf16.msra.mxu0 %v4308_v21 }
  0x42   :  { %3258 = vmatprep.subr.bf16.mxu0 %v4206_v55 }
  0x44   :  { %3096 = vmatmul.mubr.msk.f32.gmra.mrb[24].mxu0 %vm71_vm0, %v229_v22 }
  0x45   :  { %411 = vmatprep.mubr.f32.mxu0 %v4025_v3 }
  0x48   :  { %3097 = vmatmul.mubr.msk.f32.gmra.mrb[26].mxu0 %vm71_vm0, %v230_v23 }
  0x49   :  { %417 = vmatprep.mubr.f32.mxu0 %v4025_v3 }
  0x4c   :  { %3098 = vmatmul.mubr.msk.f32.gmra.mrb[28].mxu0 %vm71_vm0, %v231_v24 }
  0x4d   :  { %423 = vmatprep.mubr.f32.mxu0 %v4025_v3 }
  0x50   :  { %3099 = vmatmul.mubr.msk.f32.gmra.mrb[30].mxu0 %vm71_vm0, %v232_v25 }
  0x51   :  { %429 = vmatprep.mubr.f32.mxu0 %v4025_v3 }
  0x54   :  { %3100 = vmatmul.mubr.msk.f32.gmra.mrb[32].mxu0 %vm71_vm0, %v233_v26 }
  0x55   :  { %435 = vmatprep.mubr.f32.mxu0 %v4025_v3 }
  0x58   :  { %3101 = vmatmul.mubr.msk.f32.gmra.mrb[34].mxu0 %vm71_vm0, %v234_v27 }
  0x59   :  { %441 = vmatprep.mubr.f32.mxu0 %v4025_v3 }
  0x5c   :  { %3102 = vmatmul.mubr.msk.f32.gmra.mrb[36].mxu0 %vm71_vm0, %v235_v28 }
  0x5d   :  { %447 = vmatprep.mubr.f32.mxu0 %v4025_v3 }
  0x60   :  { %3103 = vmatmul.mubr.msk.f32.gmra.mrb[38].mxu0 %vm71_vm0, %v236_v29 }
  0x61   :  { %453 = vmatprep.mubr.f32.mxu0 %v4025_v3 }
  0x64   :  { %3104 = vmatmul.mubr.msk.f32.gmra.mrb[40].mxu0 %vm71_vm0, %v237_v30 }
  0x65   :  { %459 = vmatprep.mubr.f32.mxu0 %v4025_v3 }
  0x68   :  { %3105 = vmatmul.mubr.msk.f32.gmra.mrb[42].mxu0 %vm71_vm0, %v238_v31 }
  0x69   :  { %465 = vmatprep.mubr.f32.mxu0 %v4025_v3 }
  0x6c   :  { %3106 = vmatmul.mubr.msk.f32.gmra.mrb[44].mxu0 %vm71_vm0, %v239_v32 }
  0x6d   :  { %471 = vmatprep.mubr.f32.mxu0 %v4025_v3 }
  0x70   :  { %3107 = vmatmul.mubr.msk.f32.gmra.mrb[46].mxu0 %vm71_vm0, %v240_v33 }
  0x71   :  { %593 = vmatprep.mubr.f32.mxu0 %v4025_v3 }
  0x74   :  { %594 = vmatmul.mubr.f32.vlgmr.msra.gmra.mrb[0].mxu0 %v4025_v3 }
  0x75   :  { %3260 = vmatpush1.bf16.msra.mxu0 %v4246_v1  ;;  %695 = vmatprep.mubr.f32.mxu0 %v4025_v3 }
  0x76   :  { %3262 = vmatprep.subr.bf16.mxu0 %v4248_v2 }
  0x79   :  { %3264 = vmatpush1.bf16.msra.mxu0 %v4268_v9 }
  0x7a   :  { %3266 = vmatprep.subr.bf16.mxu0 %v4271_v10 }
  0x7d   :  { %3268 = vmatpush1.bf16.msra.mxu0 %v4291_v16 }
  0x7e   :  { %3270 = vmatprep.subr.bf16.mxu0 %v4294_v17 }
  0x81   :  { %3272 = vmatpush1.bf16.msra.mxu0 %v4308_v21 }
  0x82   :  { %3274 = vmatprep.subr.bf16.mxu0 %v4206_v55 }
 0x107   :  { %v4396_v40 = vpop.f32.mrb[16].mxu0 }
 0x108   :  { %v385_v41 = vpop.f32.mrb[17].mxu0 }
 0x109   :  { %v4399_v42 = vadd.f32 %v385_v41, %v4393_v38 }
 0x10b   :  { %v389_v44 = vpop.f32.mrb[18].mxu0 }
 0x10c   :  { %v4406_v45 = vadd.f32 %v389_v44, %v4403_v43  ;;  %v391_v46 = vpop.f32.mrb[19].mxu0 }
 0x10d   :  { %v4409_v47 = vadd.f32 %v391_v46, %v4393_v38 }
 0x10f   :  { %v395_v48 = vpop.f32.mrb[20].mxu0 }
 0x110   :  { %v4412_v49 = vadd.f32 %v395_v48, %v4403_v43  ;;  %v397_v50 = vpop.f32.mrb[21].mxu0 }
 0x111   :  { %v4415_v51 = vadd.f32 %v397_v50, %v4393_v38 }
 0x113   :  { %v401_v52 = vpop.f32.mrb[22].mxu0 }
 0x114   :  { %v4418_v53 = vadd.f32 %v401_v52, %v4403_v43  ;;  %v403_v54 = vpop.f32.mrb[23].mxu0 }
 0x115   :  { %v4421_v56 = vadd.f32 %v403_v54, %v4393_v38 }
 0x117   :  { %v407_v57 = vpop.f32.mrb[24].mxu0 }
 0x118   :  { %v4424_v58 = vadd.f32 %v407_v57, %v4403_v43  ;;  %v409_v59 = vpop.f32.mrb[25].mxu0 }
 0x119   :  { %v4427_v60 = vadd.f32 %v409_v59, %v4393_v38 }
 0x11b   :  { %v413_v61 = vpop.f32.mrb[26].mxu0 }
 0x11c   :  { %v4430_v62 = vadd.f32 %v413_v61, %v4403_v43  ;;  %v415_v63 = vpop.f32.mrb[27].mxu0  ;;  %v59_v61 = vld [vmem:[%s4924_s4] sm:$0x3]  ;;  %s4026_s4 = smov 64  }
 0x11d   :  { %v4433_v0 = vadd.f32 %v415_v63, %v4393_v38 }
 0x11f   :  { %v419_v4 = vpop.f32.mrb[28].mxu0 }
 0x120   :  { %v4436_v5 = vadd.f32 %v419_v4, %v4403_v43  ;;  %v421_v6 = vpop.f32.mrb[29].mxu0 }
 0x121   :  { %v4439_v7 = vadd.f32 %v421_v6, %v4393_v38 }
 0x123   :  { %v425_v8 = vpop.f32.mrb[30].mxu0 }
 0x124   :  { %v4442_v11 = vadd.f32 %v425_v8, %v4403_v43  ;;  %v427_v12 = vpop.f32.mrb[31].mxu0  ;;  %v4497_v8 = vrot.slane %v59_v61, %v63_v39 }
 0x125   :  { %v4445_v13 = vadd.f32 %v427_v12, %v4393_v38 }
 0x127   :  { %v431_v14 = vpop.f32.mrb[32].mxu0 }
 0x128   :  { %v4448_v15 = vadd.f32 %v431_v14, %v4403_v43  ;;  %v433_v18 = vpop.f32.mrb[33].mxu0 }
 0x129   :  { %v4451_v19 = vadd.f32 %v433_v18, %v4393_v38 }
 0x12b   :  { %v437_v20 = vpop.f32.mrb[34].mxu0 }
 0x12c   :  { %v4454_v22 = vadd.f32 %v437_v20, %v4403_v43  ;;  %v439_v23 = vpop.f32.mrb[35].mxu0 }
 0x12d   :  { %v4457_v24 = vadd.f32 %v439_v23, %v4393_v38 }
 0x12f   :  { %v443_v25 = vpop.f32.mrb[36].mxu0 }
 0x130   :  { %v4460_v26 = vadd.f32 %v443_v25, %v4403_v43  ;;  %v445_v27 = vpop.f32.mrb[37].mxu0  ;;  %v4505_v25 = vrot.slane %v59_v61, %v67_v36 }
 0x131   :  { %v4463_v28 = vadd.f32 %v445_v27, %v4393_v38 }
 0x133   :  { %v449_v29 = vpop.f32.mrb[38].mxu0 }
 0x134   :  { %v4466_v30 = vadd.f32 %v449_v29, %v4403_v43  ;;  %v451_v31 = vpop.f32.mrb[39].mxu0 }
 0x135   :  { %v4469_v32 = vadd.f32 %v451_v31, %v4393_v38 }
 0x137   :  { %v455_v33 = vpop.f32.mrb[40].mxu0 }
 0x138   :  { %v4472_v34 = vadd.f32 %v455_v33, %v4403_v43  ;;  %v457_v37 = vpop.f32.mrb[41].mxu0 }
 0x139   :  { %v4475_v41 = vadd.f32 %v457_v37, %v4393_v38 }
 0x13b   :  { %v461_v44 = vpop.f32.mrb[42].mxu0 }
 0x13c   :  { %v4478_v46 = vadd.f32 %v461_v44, %v4403_v43  ;;  %v463_v48 = vpop.f32.mrb[43].mxu0 }
 0x13d   :  { %v4481_v50 = vadd.f32 %v463_v48, %v4393_v38 }
 0x13f   :  { %v467_v52 = vpop.f32.mrb[44].mxu0 }
 0x140   :  { %v4484_v54 = vadd.f32 %v467_v52, %v4403_v43  ;;  %v469_v57 = vpop.f32.mrb[45].mxu0 }
 0x141   :  { %v4487_v59 = vadd.f32 %v469_v57, %v4393_v38 }
 0x143   :  { %v473_v63 = vpop.f32.mrb[46].mxu0 }
 0x144   :  { %v4493_v4 = vadd.f32 %v473_v63, %v4403_v43  ;;  %v475_v6 = vpop.f32.mrb[47].mxu0 }
 0x145   :  { %v4500_v12 = vadd.f32 %v475_v6, %v4393_v38 }
 0x147   :  { %v595_v14 = vpop.f32.mrb[0].mxu0 }
 0x148   :  { %v3637_v18 = vadd.f32 %v595_v14, %v4497_v8  ;;  %v597_v20 = vpop.f32.mrb[1].mxu0 }
 0x149   :  { %v3638_v27 = vadd.f32 %v597_v20, %v4505_v25 }
 0x14a   :  { %v3108_v23 = vmul.f32 -1.442695, %v3637_v18 }
 0x14b   :  { %v3109_v37 = vmul.f32 -1.442695, %v3638_v27 }
 0x14c   :  { %3737 = vpow2.f32 %v3108_v23 }
 0x14d   :  { %3739 = vtanh.f32 %v3638_v27 }
 0x156   :  { %v3738_v29 = vpop.eup %3737 }
 0x157   :  { %v610_v31 = vadd.f32 1.0, %v3738_v29  ;;  %v3740_v39 = vpop.eup %3739 }
 0x159   :  { %3741 = vrcp.f32 %v610_v31 }
 0x15a   :  { %3743 = vpow2.f32 %v3109_v37 }
 0x163   :  { %v3742_v33 = vpop.eup %3741 }
 0x164   :  { %v618_v38 = vmul.f32 %v3742_v33, %v3740_v39  ;;  %v3744_v44 = vpop.eup %3743  ;;  %v617_v52 = vmul.f32 0.0, %v3742_v33 }
 0x165   :  { %v611_v48 = vadd.f32 1.0, %v3744_v44 }
 0x166   :  { %620 = vrot.lane.b32.xlu0 %v618_v38, %s4026_s4 }
 0x167   :  { %3745 = vrcp.f32 %v611_v48 }
 0x171   :  { %v3746_v57 = vpop.eup %3745 }
 0x1d8   :  { %v621_v35 = vpop.permute.xlu0 %620 }
 0x1d9   :  { %v623_v36 = vadd.f32 %v621_v35, %v617_v52 }
 0x1db   :  { %3747 = vtanh.f32 %v623_v36 }
 0x1e5   :  { %v3748_v61 = vpop.eup %3747 }
 0x1e6   :  { %v625_v63 = vmul.f32 %v3748_v61, %v3746_v57 }
 0x1e8   :  { %627 = vrot.lane.b32.xlu0 %v625_v63, %s4026_s4 }
 0x25a   :  { %v628_v6 = vpop.permute.xlu0 %627 }
 0x25b   :  { %3110 = vmatmul.mubr.msk.f32.vlgmr.msra.gmra.mrb[2].mxu0 %vm71_vm0, %v628_v6 }
 0x25c   :  { %3276 = vmatpush1.bf16.msra.mxu0 %v4246_v1  ;;  %797 = vmatprep.mubr.f32.mxu0 %v4025_v3 }
 0x25d   :  { %3278 = vmatprep.subr.bf16.mxu0 %v4248_v2 }
 0x260   :  { %3280 = vmatpush1.bf16.msra.mxu0 %v4268_v9 }
 0x261   :  { %3282 = vmatprep.subr.bf16.mxu0 %v4271_v10 }
 0x264   :  { %3284 = vmatpush1.bf16.msra.mxu0 %v4291_v16 }
 0x265   :  { %3286 = vmatprep.subr.bf16.mxu0 %v4294_v17 }
 0x268   :  { %3288 = vmatpush1.bf16.msra.mxu0 %v4308_v21 }
 0x269   :  { %3290 = vmatprep.subr.bf16.mxu0 %v4206_v55 }
 0x32e   :  { %v697_v14 = vpop.f32.mrb[2].mxu0 }
 0x32f   :  { %v3639_v18 = vadd.f32 %v697_v14, %v4497_v8  ;;  %v699_v20 = vpop.f32.mrb[3].mxu0 }
 0x330   :  { %v3640_v27 = vadd.f32 %v699_v20, %v4505_v25 }
 0x331   :  { %v3111_v23 = vmul.f32 -1.442695, %v3639_v18 }
 0x332   :  { %v3112_v37 = vmul.f32 -1.442695, %v3640_v27 }
 0x333   :  { %3749 = vpow2.f32 %v3111_v23 }
 0x334   :  { %3751 = vtanh.f32 %v3640_v27 }
 0x33d   :  { %v3750_v29 = vpop.eup %3749 }
 0x33e   :  { %v712_v31 = vadd.f32 1.0, %v3750_v29  ;;  %v3752_v39 = vpop.eup %3751 }
 0x340   :  { %3753 = vrcp.f32 %v712_v31 }
 0x341   :  { %3755 = vpow2.f32 %v3112_v37 }
 0x34a   :  { %v3754_v33 = vpop.eup %3753 }
 0x34b   :  { %v720_v38 = vmul.f32 %v3754_v33, %v3752_v39  ;;  %v3756_v44 = vpop.eup %3755  ;;  %v719_v52 = vmul.f32 %v3754_v33, %v623_v36 }
 0x34c   :  { %v713_v48 = vadd.f32 1.0, %v3756_v44 }
 0x34d   :  { %722 = vrot.lane.b32.xlu1 %v720_v38, %s4026_s4 }
 0x34e   :  { %3757 = vrcp.f32 %v713_v48 }
 0x358   :  { %v3758_v61 = vpop.eup %3757 }
 0x3bf   :  { %v723_v35 = vpop.permute.xlu1 %722 }
 0x3c0   :  { %v725_v57 = vadd.f32 %v723_v35, %v719_v52 }
 0x3c2   :  { %3759 = vtanh.f32 %v725_v57 }
 0x3cc   :  { %v3760_v63 = vpop.eup %3759 }
 0x3cd   :  { %v727_v6 = vmul.f32 %v3760_v63, %v3758_v61 }
 0x3cf   :  { %729 = vrot.lane.b32.xlu1 %v727_v6, %s4026_s4 }
 0x441   :  { %v730_v14 = vpop.permute.xlu1 %729 }
 0x442   :  { %3113 = vmatmul.mubr.msk.f32.vlgmr.msra.gmra.mrb[4].mxu0 %vm71_vm0, %v730_v14 }
 0x443   :  { %3292 = vmatpush1.bf16.msra.mxu0 %v4246_v1  ;;  %899 = vmatprep.mubr.f32.mxu0 %v4025_v3 }
 0x444   :  { %3294 = vmatprep.subr.bf16.mxu0 %v4248_v2 }
 0x447   :  { %3296 = vmatpush1.bf16.msra.mxu0 %v4268_v9 }
 0x448   :  { %3298 = vmatprep.subr.bf16.mxu0 %v4271_v10 }
 0x44b   :  { %3300 = vmatpush1.bf16.msra.mxu0 %v4291_v16 }
 0x44c   :  { %3302 = vmatprep.subr.bf16.mxu0 %v4294_v17 }
 0x44f   :  { %3304 = vmatpush1.bf16.msra.mxu0 %v4308_v21 }
 0x450   :  { %3306 = vmatprep.subr.bf16.mxu0 %v4206_v55 }
 0x515   :  { %v799_v36 = vpop.f32.mrb[4].mxu0 }
 0x516   :  { %v3641_v18 = vadd.f32 %v799_v36, %v4497_v8  ;;  %v801_v20 = vpop.f32.mrb[5].mxu0 }
 0x517   :  { %v3642_v27 = vadd.f32 %v801_v20, %v4505_v25 }
 0x518   :  { %v3114_v23 = vmul.f32 -1.442695, %v3641_v18 }
 0x519   :  { %v3115_v37 = vmul.f32 -1.442695, %v3642_v27 }
 0x51a   :  { %3761 = vpow2.f32 %v3114_v23 }
 0x51b   :  { %3763 = vtanh.f32 %v3642_v27 }
 0x524   :  { %v3762_v29 = vpop.eup %3761 }
 0x525   :  { %v814_v31 = vadd.f32 1.0, %v3762_v29  ;;  %v3764_v39 = vpop.eup %3763 }
 0x527   :  { %3765 = vrcp.f32 %v814_v31 }
 0x528   :  { %3767 = vpow2.f32 %v3115_v37 }
 0x531   :  { %v3766_v33 = vpop.eup %3765 }
 0x532   :  { %v822_v38 = vmul.f32 %v3766_v33, %v3764_v39  ;;  %v3768_v44 = vpop.eup %3767  ;;  %v821_v52 = vmul.f32 %v3766_v33, %v725_v57 }
 0x533   :  { %v815_v48 = vadd.f32 1.0, %v3768_v44 }
 0x534   :  { %824 = vrot.lane.b32.xlu0 %v822_v38, %s4026_s4 }
 0x535   :  { %3769 = vrcp.f32 %v815_v48 }
 0x53f   :  { %v3770_v63 = vpop.eup %3769 }
 0x5a6   :  { %v825_v35 = vpop.permute.xlu0 %824 }
 0x5a7   :  { %v827_v61 = vadd.f32 %v825_v35, %v821_v52 }
 0x5a9   :  { %3771 = vtanh.f32 %v827_v61 }
 0x5b3   :  { %v3772_v6 = vpop.eup %3771 }
 0x5b4   :  { %v829_v14 = vmul.f32 %v3772_v6, %v3770_v63 }
 0x5b6   :  { %831 = vrot.lane.b32.xlu1 %v829_v14, %s4026_s4 }
 0x628   :  { %v832_v36 = vpop.permute.xlu1 %831 }
 0x629   :  { %3116 = vmatmul.mubr.msk.f32.vlgmr.msra.gmra.mrb[6].mxu0 %vm71_vm0, %v832_v36 }
 0x62a   :  { %3308 = vmatpush1.bf16.msra.mxu0 %v4246_v1  ;;  %1001 = vmatprep.mubr.f32.mxu0 %v4025_v3 }
 0x62b   :  { %3310 = vmatprep.subr.bf16.mxu0 %v4248_v2 }
 0x62e   :  { %3312 = vmatpush1.bf16.msra.mxu0 %v4268_v9 }
 0x62f   :  { %3314 = vmatprep.subr.bf16.mxu0 %v4271_v10 }
 0x632   :  { %3316 = vmatpush1.bf16.msra.mxu0 %v4291_v16 }
 0x633   :  { %3318 = vmatprep.subr.bf16.mxu0 %v4294_v17 }
 0x636   :  { %3320 = vmatpush1.bf16.msra.mxu0 %v4308_v21 }
 0x637   :  { %3322 = vmatprep.subr.bf16.mxu0 %v4206_v55 }
 0x6fc   :  { %v901_v57 = vpop.f32.mrb[6].mxu0 }
 0x6fd   :  { %v3643_v18 = vadd.f32 %v901_v57, %v4497_v8  ;;  %v903_v20 = vpop.f32.mrb[7].mxu0 }
 0x6fe   :  { %v3644_v27 = vadd.f32 %v903_v20, %v4505_v25 }
 0x6ff   :  { %v3117_v23 = vmul.f32 -1.442695, %v3643_v18 }
 0x700   :  { %v3118_v37 = vmul.f32 -1.442695, %v3644_v27 }
 0x701   :  { %3773 = vpow2.f32 %v3117_v23 }
 0x702   :  { %3775 = vtanh.f32 %v3644_v27 }
 0x70b   :  { %v3774_v29 = vpop.eup %3773 }
 0x70c   :  { %v916_v31 = vadd.f32 1.0, %v3774_v29  ;;  %v3776_v39 = vpop.eup %3775 }
 0x70e   :  { %3777 = vrcp.f32 %v916_v31 }
 0x70f   :  { %3779 = vpow2.f32 %v3118_v37 }
 0x718   :  { %v3778_v33 = vpop.eup %3777 }
 0x719   :  { %v924_v38 = vmul.f32 %v3778_v33, %v3776_v39  ;;  %v3780_v44 = vpop.eup %3779  ;;  %v923_v52 = vmul.f32 %v3778_v33, %v827_v61 }
 0x71a   :  { %v917_v48 = vadd.f32 1.0, %v3780_v44 }
 0x71b   :  { %926 = vrot.lane.b32.xlu0 %v924_v38, %s4026_s4 }
 0x71c   :  { %3781 = vrcp.f32 %v917_v48 }
 0x726   :  { %v3782_v6 = vpop.eup %3781 }
 0x78d   :  { %v927_v35 = vpop.permute.xlu0 %926 }
 0x78e   :  { %v929_v63 = vadd.f32 %v927_v35, %v923_v52 }
 0x790   :  { %3783 = vtanh.f32 %v929_v63 }
 0x79a   :  { %v3784_v14 = vpop.eup %3783 }
 0x79b   :  { %v931_v36 = vmul.f32 %v3784_v14, %v3782_v6 }
 0x79d   :  { %933 = vrot.lane.b32.xlu1 %v931_v36, %s4026_s4 }
 0x80f   :  { %v934_v57 = vpop.permute.xlu1 %933 }
 0x810   :  { %3119 = vmatmul.mubr.msk.f32.vlgmr.msra.gmra.mrb[8].mxu0 %vm71_vm0, %v934_v57 }
 0x811   :  { %3324 = vmatpush1.bf16.msra.mxu0 %v4246_v1  ;;  %1103 = vmatprep.mubr.f32.mxu0 %v4025_v3 }
 0x812   :  { %3326 = vmatprep.subr.bf16.mxu0 %v4248_v2 }
 0x815   :  { %3328 = vmatpush1.bf16.msra.mxu0 %v4268_v9 }
 0x816   :  { %3330 = vmatprep.subr.bf16.mxu0 %v4271_v10 }
 0x819   :  { %3332 = vmatpush1.bf16.msra.mxu0 %v4291_v16 }
 0x81a   :  { %3334 = vmatprep.subr.bf16.mxu0 %v4294_v17 }
 0x81d   :  { %3336 = vmatpush1.bf16.msra.mxu0 %v4308_v21 }
 0x81e   :  { %3338 = vmatprep.subr.bf16.mxu0 %v4206_v55 }
 0x8e3   :  { %v1003_v61 = vpop.f32.mrb[8].mxu0 }
 0x8e4   :  { %v3645_v18 = vadd.f32 %v1003_v61, %v4497_v8  ;;  %v1005_v20 = vpop.f32.mrb[9].mxu0 }
 0x8e5   :  { %v3646_v27 = vadd.f32 %v1005_v20, %v4505_v25 }
 0x8e6   :  { %v3120_v23 = vmul.f32 -1.442695, %v3645_v18 }
 0x8e7   :  { %v3121_v37 = vmul.f32 -1.442695, %v3646_v27 }
 0x8e8   :  { %3785 = vpow2.f32 %v3120_v23 }
 0x8e9   :  { %3787 = vtanh.f32 %v3646_v27 }
 0x8f2   :  { %v3786_v29 = vpop.eup %3785 }
 0x8f3   :  { %v1018_v31 = vadd.f32 1.0, %v3786_v29  ;;  %v3788_v39 = vpop.eup %3787 }
 0x8f5   :  { %3789 = vrcp.f32 %v1018_v31 }
 0x8f6   :  { %3791 = vpow2.f32 %v3121_v37 }
 0x8ff   :  { %v3790_v33 = vpop.eup %3789 }
 0x900   :  { %v1026_v38 = vmul.f32 %v3790_v33, %v3788_v39  ;;  %v3792_v44 = vpop.eup %3791  ;;  %v1025_v52 = vmul.f32 %v3790_v33, %v929_v63 }
 0x901   :  { %v1019_v48 = vadd.f32 1.0, %v3792_v44 }
 0x902   :  { %1028 = vrot.lane.b32.xlu0 %v1026_v38, %s4026_s4 }
 0x903   :  { %3793 = vrcp.f32 %v1019_v48 }
 0x90d   :  { %v3794_v14 = vpop.eup %3793 }
 0x974   :  { %v1029_v35 = vpop.permute.xlu0 %1028 }
 0x975   :  { %v1031_v6 = vadd.f32 %v1029_v35, %v1025_v52 }
 0x977   :  { %3795 = vtanh.f32 %v1031_v6 }
 0x981   :  { %v3796_v36 = vpop.eup %3795 }
 0x982   :  { %v1033_v57 = vmul.f32 %v3796_v36, %v3794_v14 }
 0x984   :  { %1035 = vrot.lane.b32.xlu1 %v1033_v57, %s4026_s4 }
 0x9f6   :  { %v1036_v61 = vpop.permute.xlu1 %1035 }
 0x9f7   :  { %3122 = vmatmul.mubr.msk.f32.vlgmr.msra.gmra.mrb[10].mxu0 %vm71_vm0, %v1036_v61 }
 0x9f8   :  { %3340 = vmatpush1.bf16.msra.mxu0 %v4246_v1  ;;  %1205 = vmatprep.mubr.f32.mxu0 %v4025_v3 }
 0x9f9   :  { %3342 = vmatprep.subr.bf16.mxu0 %v4248_v2 }
 0x9fc   :  { %3344 = vmatpush1.bf16.msra.mxu0 %v4268_v9 }
 0x9fd   :  { %3346 = vmatprep.subr.bf16.mxu0 %v4271_v10 }
 0xa00   :  { %3348 = vmatpush1.bf16.msra.mxu0 %v4291_v16 }
 0xa01   :  { %3350 = vmatprep.subr.bf16.mxu0 %v4294_v17 }
 0xa04   :  { %3352 = vmatpush1.bf16.msra.mxu0 %v4308_v21 }
 0xa05   :  { %3354 = vmatprep.subr.bf16.mxu0 %v4206_v55 }
 0xaca   :  { %v1105_v63 = vpop.f32.mrb[10].mxu0 }
 0xacb   :  { %v3647_v18 = vadd.f32 %v1105_v63, %v4497_v8  ;;  %v1107_v20 = vpop.f32.mrb[11].mxu0 }
 0xacc   :  { %v3648_v27 = vadd.f32 %v1107_v20, %v4505_v25 }
 0xacd   :  { %v3123_v23 = vmul.f32 -1.442695, %v3647_v18 }
 0xace   :  { %v3124_v37 = vmul.f32 -1.442695, %v3648_v27 }
 0xacf   :  { %3797 = vpow2.f32 %v3123_v23 }
 0xad0   :  { %3799 = vtanh.f32 %v3648_v27 }
 0xad9   :  { %v3798_v29 = vpop.eup %3797 }
 0xada   :  { %v1120_v31 = vadd.f32 1.0, %v3798_v29  ;;  %v3800_v39 = vpop.eup %3799 }
 0xadc   :  { %3801 = vrcp.f32 %v1120_v31 }
 0xadd   :  { %3803 = vpow2.f32 %v3124_v37 }
 0xae6   :  { %v3802_v33 = vpop.eup %3801 }
 0xae7   :  { %v1128_v38 = vmul.f32 %v3802_v33, %v3800_v39  ;;  %v3804_v55 = vpop.eup %3803  ;;  %v1127_v48 = vmul.f32 %v3802_v33, %v1031_v6 }
 0xae8   :  { %v1121_v44 = vadd.f32 1.0, %v3804_v55 }
 0xae9   :  { %1130 = vrot.lane.b32.xlu0 %v1128_v38, %s4026_s4 }
 0xaea   :  { %3805 = vrcp.f32 %v1121_v44 }
 0xaf4   :  { %v3806_v14 = vpop.eup %3805 }
 0xb5b   :  { %v1131_v52 = vpop.permute.xlu0 %1130 }
 0xb5c   :  { %v1133_v35 = vadd.f32 %v1131_v52, %v1127_v48 }
 0xb5e   :  { %3807 = vtanh.f32 %v1133_v35 }
 0xb68   :  { %v3808_v36 = vpop.eup %3807 }
 0xb69   :  { %v1135_v57 = vmul.f32 %v3808_v36, %v3806_v14 }
 0xb6b   :  { %1137 = vrot.lane.b32.xlu1 %v1135_v57, %s4026_s4 }
 0xbdd   :  { %v1138_v61 = vpop.permute.xlu1 %1137 }
 0xbde   :  { %3125 = vmatmul.mubr.msk.f32.vlgmr.msra.gmra.mrb[12].mxu0 %vm71_vm0, %v1138_v61 }
 0xbdf   :  { %3356 = vmatpush1.bf16.msra.mxu0 %v4246_v1  ;;  %1307 = vmatprep.mubr.f32.mxu0 %v4025_v3 }
 0xbe0   :  { %3358 = vmatprep.subr.bf16.mxu0 %v4248_v2 }
 0xbe3   :  { %3360 = vmatpush1.bf16.msra.mxu0 %v4268_v9 }
 0xbe4   :  { %3362 = vmatprep.subr.bf16.mxu0 %v4271_v10 }
 0xbe7   :  { %3364 = vmatpush1.bf16.msra.mxu0 %v4291_v16 }
 0xbe8   :  { %3366 = vmatprep.subr.bf16.mxu0 %v4294_v17 }
 0xbeb   :  { %3368 = vmatpush1.bf16.msra.mxu0 %v4308_v21 }
 0xcb1   :  { %v1207_v6 = vpop.f32.mrb[12].mxu0 }
 0xcb2   :  { %v3649_v63 = vadd.f32 %v1207_v6, %v4497_v8  ;;  %v1209_v18 = vpop.f32.mrb[13].mxu0 }
 0xcb3   :  { %v3650_v1 = vadd.f32 %v1209_v18, %v4505_v25  ;;  %v1341_v18 = vld [vmem:[%s4925_s6 + $0x8] sm:$0xff] }
 0xcb4   :  { %v3126_v20 = vmul.f32 -1.442695, %v3649_v63 }
 0xcb5   :  { %v3127_v16 = vmul.f32 -1.442695, %v3650_v1 }
 0xcb6   :  { %3809 = vpow2.f32 %v3126_v20 }
 0xcb7   :  { %3811 = vtanh.f32 %v3650_v1  ;;  %v1342_v1 = vld [vmem:[%s4925_s6 + $0x10] sm:$0xff] }
 0xcc0   :  { %v3810_v23 = vpop.eup %3809 }
 0xcc1   :  { %v1222_v2 = vadd.f32 1.0, %v3810_v23  ;;  %v3812_v9 = vpop.eup %3811  ;;  %v1345_v23 = vld [vmem:[%s4925_s6 + $0x28] sm:$0xff] }
 0xcc3   :  { %3813 = vrcp.f32 %v1222_v2  ;;  %v1347_v2 = vld [vmem:[%s4925_s6 + $0x38] sm:$0xff] }
 0xcc4   :  { %3815 = vpow2.f32 %v3127_v16  ;;  %v1346_v16 = vld [vmem:[%s4925_s6 + $0x30] sm:$0xff] }
 0xccd   :  { %v3814_v10 = vpop.eup %3813 }
 0xcce   :  { %v1230_v27 = vmul.f32 %v3814_v10, %v3812_v9  ;;  %v3816_v17 = vpop.eup %3815  ;;  %v1229_v29 = vmul.f32 %v3814_v10, %v1133_v35  ;;  %v4619_v10 = vpack.c.bf16 %v1347_v2, %v1345_v23 }
 0xccf   :  { %v1223_v21 = vadd.f32 1.0, %v3816_v17  ;;  %v1349_v17 = vld [vmem:[%s4925_s6 + $0x48] sm:$0xff] }
 0xcd0   :  { %1232 = vrot.lane.b32.xlu0 %v1230_v27, %s4026_s4  ;;  %v1344_v27 = vld [vmem:[%s4925_s6 + $0x20] sm:$0xff] }
 0xcd1   :  { %3817 = vrcp.f32 %v1223_v21  ;;  %v1351_v21 = vld [vmem:[%s4925_s6 + $0x58] sm:$0xff] }
 0xcdb   :  { %v3818_v33 = vpop.eup %3817 }
 0xd42   :  { %v1233_v31 = vpop.permute.xlu0 %1232 }
 0xd43   :  { %v1235_v39 = vadd.f32 %v1233_v31, %v1229_v29  ;;  %v4635_v29 = vpack.c.bf16 %v1346_v16, %v1344_v27  ;;  %v4638_v31 = vpack.c.bf16 %v1351_v21, %v1349_v17 }
 0xd45   :  { %3819 = vtanh.f32 %v1235_v39 }
 0xd4f   :  { %v3820_v38 = vpop.eup %3819 }
 0xd50   :  { %v1237_v37 = vmul.f32 %v3820_v38, %v3818_v33  ;;  %v1348_v33 = vld [vmem:[%s4925_s6 + $0x40] sm:$0xff]  ;;  %v1350_v38 = vld [vmem:[%s4925_s6 + $0x50] sm:$0xff] }
 0xd52   :  { %1239 = vrot.lane.b32.xlu1 %v1237_v37, %s4026_s4  ;;  %v1353_v37 = vld [vmem:[%s4925_s6 + $0x68] sm:$0xff] }
 0xdc4   :  { %v1240_v55 = vpop.permute.xlu1 %1239 }
 0xdc5   :  { %3128 = vmatmul.mubr.msk.f32.vlgmr.msra.gmra.mrb[14].mxu0 %vm71_vm0, %v1240_v55  ;;  %v1355_v55 = vld [vmem:[%s4925_s6 + $0x78] sm:$0xff] }
 0xdc6   :  { %3206 = vmatprep.mubr.msk.f32.mxu0 %vm4028_vm1, %v4025_v3 }
 0xe98   :  { %v1309_v44 = vpop.f32.mrb[14].mxu0 }
 0xe99   :  { %v3651_v48 = vadd.f32 %v1309_v44, %v4497_v8  ;;  %v1311_v52 = vpop.f32.mrb[15].mxu0  ;;  %v1343_v8 = vld [vmem:[%s4925_s6 + $0x18] sm:$0xff]  ;;  %v4653_v44 = vpack.c.bf16 %v1350_v38, %v1348_v33 }
 0xe9a   :  { %v3652_v35 = vadd.f32 %v1311_v52, %v4505_v25  ;;  %v1340_v25 = vld [vmem:[%s4925_s6] sm:$0xff]  ;;  %v4606_v20 = vpack.c.bf16 %v1343_v8, %v1341_v18 }
 0xe9b   :  { %v3129_v14 = vmul.f32 -1.442695, %v3651_v48  ;;  %v4617_v9 = vpack.c.bf16 %v1342_v1, %v1340_v25  ;;  %v4656_v48 = vpack.c.bf16 %v1355_v55, %v1353_v37  ;;  %v1352_v52 = vld [vmem:[%s4925_s6 + $0x60] sm:$0xff] }
 0xe9c   :  { %3370 = vmatprep.subr.bf16.mxu1 %v4606_v20 }
 0xe9d   :  { %3821 = vpow2.f32 %v3129_v14  ;;  %3372 = vmatpush1.bf16.msra.mxu1 %v4617_v9  ;;  %v1354_v14 = vld [vmem:[%s4925_s6 + $0x70] sm:$0xff] }
 0xe9e   :  { %3823 = vtanh.f32 %v3652_v35  ;;  %3374 = vmatprep.subr.bf16.mxu1 %v4619_v10 }
 0xea1   :  { %3376 = vmatpush1.bf16.msra.mxu1 %v4635_v29 }
 0xea2   :  { %3378 = vmatprep.subr.bf16.mxu1 %v4638_v31 }
 0xea5   :  { %3380 = vmatpush1.bf16.msra.mxu1 %v4653_v44 }
 0xea6   :  { %3382 = vmatprep.subr.bf16.mxu1 %v4656_v48 }
 0xea7   :  { %v3822_v36 = vpop.eup %3821 }
 0xea8   :  { %v1324_v57 = vadd.f32 1.0, %v3822_v36  ;;  %v3824_v61 = vpop.eup %3823  ;;  %v4665_v36 = vpack.c.bf16 %v1354_v14, %v1352_v52 }
 0xeaa   :  { %3825 = vrcp.f32 %v1324_v57  ;;  %3384 = vmatpush1.bf16.msra.mxu1 %v4665_v36  ;;  %v3130_v57 = vmul.f32 -1.442695, %v3652_v35 }
 0xeab   :  { %3386 = vmatprep.subr.bf16.mxu1 %v4606_v20 }
 0xeac   :  { %3827 = vpow2.f32 %v3130_v57 }
 0xeb4   :  { %v3826_v6 = vpop.eup %3825 }
 0xeb5   :  { %v1332_v63 = vmul.f32 %v3826_v6, %v3824_v61  ;;  %v1331_v18 = vmul.f32 %v3826_v6, %v1235_v39  ;;  %v384_v39 = vadd.f32 %v4396_v40, %v4403_v43 }
 0xeb6   :  { %v3828_v61 = vpop.eup %3827 }
 0xeb7   :  { %1334 = vrot.lane.b32.xlu0 %v1332_v63, %s4026_s4  ;;  %v1325_v63 = vadd.f32 1.0, %v3828_v61 }
 0xeb9   :  { %3829 = vrcp.f32 %v1325_v63 }
 0xec3   :  { %v3830_v1 = vpop.eup %3829 }
 0xf29   :  { %v1335_v8 = vpop.permute.xlu0 %1334 }
 0xf2a   :  { %v1337_v25 = vadd.f32 %v1335_v8, %v1331_v18 }
 0xf2c   :  { %3831 = vtanh.f32 %v1337_v25 }
 0xf36   :  { %v3832_v23 = vpop.eup %3831 }
 0xf37   :  { %v1339_v2 = vmul.f32 %v3832_v23, %v3830_v1 }
 0xf39   :  { %1357 = vrot.lane.b32.xlu1 %v1339_v2, %s4026_s4 }
 0xfab   :  { %v1358_v27 = vpop.permute.xlu1 %1357 }
 0xfac   :  { %3131 = vmatmul.mubr.msk.f32.vlgmr.msra.gmra.mrb[0].mxu1 %vm71_vm0, %v1358_v27 }
 0xfad   :  { %3388 = vmatpush1.bf16.msra.mxu1 %v4617_v9  ;;  %1527 = vmatprep.mubr.f32.mxu1 %v4025_v3 }
 0xfae   :  { %3390 = vmatprep.subr.bf16.mxu1 %v4619_v10 }
 0xfb1   :  { %3392 = vmatpush1.bf16.msra.mxu1 %v4635_v29 }
 0xfb2   :  { %3394 = vmatprep.subr.bf16.mxu1 %v4638_v31 }
 0xfb5   :  { %3396 = vmatpush1.bf16.msra.mxu1 %v4653_v44 }
 0xfb6   :  { %3398 = vmatprep.subr.bf16.mxu1 %v4656_v48 }
 0xfb9   :  { %3400 = vmatpush1.bf16.msra.mxu1 %v4665_v36 }
 0xfba   :  { %3402 = vmatprep.subr.bf16.mxu1 %v4606_v20 }
0x107f   :  { %v1427_v35 = vpop.f32.mrb[0].mxu1 }
0x1080   :  { %v1434_v6 = vadd.f32 %v1427_v35, %v384_v39  ;;  %v1429_v16 = vpop.f32.mrb[1].mxu1 }
0x1081   :  { %v1435_v17 = vadd.f32 %v1429_v16, %v4399_v42 }
0x1082   :  { %v3132_v21 = vmul.f32 -1.442695, %v1434_v6 }
0x1083   :  { %v3133_v14 = vmul.f32 -1.442695, %v1435_v17 }
0x1084   :  { %3833 = vpow2.f32 %v3132_v21 }
0x1085   :  { %3835 = vtanh.f32 %v1435_v17 }
0x108e   :  { %v3834_v33 = vpop.eup %3833 }
0x108f   :  { %v1442_v38 = vadd.f32 1.0, %v3834_v33  ;;  %v3836_v37 = vpop.eup %3835 }
0x1091   :  { %3837 = vrcp.f32 %v1442_v38 }
0x1092   :  { %3839 = vpow2.f32 %v3133_v14 }
0x109b   :  { %v3838_v55 = vpop.eup %3837 }
0x109c   :  { %v1450_v52 = vmul.f32 %v3838_v55, %v3836_v37  ;;  %v3840_v57 = vpop.eup %3839  ;;  %v1449_v43 = vmul.f32 %v3838_v55, %v1337_v25 }
0x109d   :  { %v1443_v40 = vadd.f32 1.0, %v3840_v57 }
0x109e   :  { %1452 = vrot.lane.b32.xlu0 %v1450_v52, %s4026_s4 }
0x109f   :  { %3841 = vrcp.f32 %v1443_v40 }
0x10a9   :  { %v3842_v42 = vpop.eup %3841 }
0x1110   :  { %v1453_v61 = vpop.permute.xlu0 %1452 }
0x1111   :  { %v1455_v63 = vadd.f32 %v1453_v61, %v1449_v43 }
0x1113   :  { %3843 = vtanh.f32 %v1455_v63 }
0x111d   :  { %v3844_v18 = vpop.eup %3843 }
0x111e   :  { %v1457_v8 = vmul.f32 %v3844_v18, %v3842_v42 }
0x1120   :  { %1459 = vrot.lane.b32.xlu1 %v1457_v8, %s4026_s4 }
0x1192   :  { %v1460_v1 = vpop.permute.xlu1 %1459 }
0x1193   :  { %3134 = vmatmul.mubr.msk.f32.vlgmr.msra.gmra.mrb[2].mxu1 %vm71_vm0, %v1460_v1 }
0x1194   :  { %3404 = vmatpush1.bf16.msra.mxu1 %v4617_v9  ;;  %1629 = vmatprep.mubr.f32.mxu1 %v4025_v3 }
0x1195   :  { %3406 = vmatprep.subr.bf16.mxu1 %v4619_v10 }
0x1198   :  { %3408 = vmatpush1.bf16.msra.mxu1 %v4635_v29 }
0x1199   :  { %3410 = vmatprep.subr.bf16.mxu1 %v4638_v31 }
0x119c   :  { %3412 = vmatpush1.bf16.msra.mxu1 %v4653_v44 }
0x119d   :  { %3414 = vmatprep.subr.bf16.mxu1 %v4656_v48 }
0x11a0   :  { %3416 = vmatpush1.bf16.msra.mxu1 %v4665_v36 }
0x11a1   :  { %3418 = vmatprep.subr.bf16.mxu1 %v4606_v20 }
0x1266   :  { %v1529_v25 = vpop.f32.mrb[2].mxu1 }
0x1267   :  { %v1536_v23 = vadd.f32 %v1529_v25, %v4406_v45  ;;  %v1531_v2 = vpop.f32.mrb[3].mxu1 }
0x1268   :  { %v1537_v27 = vadd.f32 %v1531_v2, %v4409_v47 }
0x1269   :  { %v3135_v39 = vmul.f32 -1.442695, %v1536_v23 }
0x126a   :  { %v3136_v33 = vmul.f32 -1.442695, %v1537_v27 }
0x126b   :  { %3845 = vpow2.f32 %v3135_v39 }
0x126c   :  { %3847 = vtanh.f32 %v1537_v27 }
0x1275   :  { %v3846_v35 = vpop.eup %3845 }
0x1276   :  { %v1544_v6 = vadd.f32 1.0, %v3846_v35  ;;  %v3848_v16 = vpop.eup %3847 }
0x1278   :  { %3849 = vrcp.f32 %v1544_v6 }
0x1279   :  { %3851 = vpow2.f32 %v3136_v33 }
0x1282   :  { %v3850_v17 = vpop.eup %3849 }
0x1283   :  { %v1552_v21 = vmul.f32 %v3850_v17, %v3848_v16  ;;  %v3852_v38 = vpop.eup %3851  ;;  %v1551_v55 = vmul.f32 %v3850_v17, %v1455_v63 }
0x1284   :  { %v1545_v37 = vadd.f32 1.0, %v3852_v38 }
0x1285   :  { %1554 = vrot.lane.b32.xlu0 %v1552_v21, %s4026_s4 }
0x1286   :  { %3853 = vrcp.f32 %v1545_v37 }
0x1290   :  { %v3854_v47 = vpop.eup %3853 }
0x12f7   :  { %v1555_v45 = vpop.permute.xlu0 %1554 }
0x12f8   :  { %v1557_v52 = vadd.f32 %v1555_v45, %v1551_v55 }
0x12fa   :  { %3855 = vtanh.f32 %v1557_v52 }
0x1304   :  { %v3856_v14 = vpop.eup %3855 }
0x1305   :  { %v1559_v57 = vmul.f32 %v3856_v14, %v3854_v47 }
0x1307   :  { %1561 = vrot.lane.b32.xlu1 %v1559_v57, %s4026_s4 }
0x1379   :  { %v1562_v40 = vpop.permute.xlu1 %1561 }
0x137a   :  { %3137 = vmatmul.mubr.msk.f32.vlgmr.msra.gmra.mrb[4].mxu1 %vm71_vm0, %v1562_v40 }
0x137b   :  { %3420 = vmatpush1.bf16.msra.mxu1 %v4617_v9  ;;  %1731 = vmatprep.mubr.f32.mxu1 %v4025_v3 }
0x137c   :  { %3422 = vmatprep.subr.bf16.mxu1 %v4619_v10 }
0x137f   :  { %3424 = vmatpush1.bf16.msra.mxu1 %v4635_v29 }
0x1380   :  { %3426 = vmatprep.subr.bf16.mxu1 %v4638_v31 }
0x1383   :  { %3428 = vmatpush1.bf16.msra.mxu1 %v4653_v44 }
0x1384   :  { %3430 = vmatprep.subr.bf16.mxu1 %v4656_v48 }
0x1387   :  { %3432 = vmatpush1.bf16.msra.mxu1 %v4665_v36 }
0x1388   :  { %3434 = vmatprep.subr.bf16.mxu1 %v4606_v20 }
0x144d   :  { %v1631_v43 = vpop.f32.mrb[4].mxu1 }
0x144e   :  { %v1638_v61 = vadd.f32 %v1631_v43, %v4412_v49  ;;  %v1633_v63 = vpop.f32.mrb[5].mxu1 }
0x144f   :  { %v1639_v42 = vadd.f32 %v1633_v63, %v4415_v51 }
0x1450   :  { %v3138_v18 = vmul.f32 -1.442695, %v1638_v61 }
0x1451   :  { %v3139_v27 = vmul.f32 -1.442695, %v1639_v42 }
0x1452   :  { %3857 = vpow2.f32 %v3138_v18 }
0x1453   :  { %3859 = vtanh.f32 %v1639_v42 }
0x145c   :  { %v3858_v8 = vpop.eup %3857 }
0x145d   :  { %v1646_v1 = vadd.f32 1.0, %v3858_v8  ;;  %v3860_v25 = vpop.eup %3859 }
0x145f   :  { %3861 = vrcp.f32 %v1646_v1 }
0x1460   :  { %3863 = vpow2.f32 %v3139_v27 }
0x1469   :  { %v3862_v23 = vpop.eup %3861 }
0x146a   :  { %v1654_v2 = vmul.f32 %v3862_v23, %v3860_v25  ;;  %v3864_v39 = vpop.eup %3863  ;;  %v1653_v6 = vmul.f32 %v3862_v23, %v1557_v52 }
0x146b   :  { %v1647_v35 = vadd.f32 1.0, %v3864_v39 }
0x146c   :  { %1656 = vrot.lane.b32.xlu0 %v1654_v2, %s4026_s4 }
0x146d   :  { %3865 = vrcp.f32 %v1647_v35 }
0x1477   :  { %v3866_v51 = vpop.eup %3865 }
0x14de   :  { %v1657_v49 = vpop.permute.xlu0 %1656 }
0x14df   :  { %v1659_v16 = vadd.f32 %v1657_v49, %v1653_v6 }
0x14e1   :  { %3867 = vtanh.f32 %v1659_v16 }
0x14eb   :  { %v3868_v17 = vpop.eup %3867 }
0x14ec   :  { %v1661_v21 = vmul.f32 %v3868_v17, %v3866_v51 }
0x14ee   :  { %1663 = vrot.lane.b32.xlu1 %v1661_v21, %s4026_s4 }
0x1560   :  { %v1664_v33 = vpop.permute.xlu1 %1663 }
0x1561   :  { %3140 = vmatmul.mubr.msk.f32.vlgmr.msra.gmra.mrb[6].mxu1 %vm71_vm0, %v1664_v33 }
0x1562   :  { %3436 = vmatpush1.bf16.msra.mxu1 %v4617_v9  ;;  %1833 = vmatprep.mubr.f32.mxu1 %v4025_v3 }
0x1563   :  { %3438 = vmatprep.subr.bf16.mxu1 %v4619_v10 }
0x1566   :  { %3440 = vmatpush1.bf16.msra.mxu1 %v4635_v29 }
0x1567   :  { %3442 = vmatprep.subr.bf16.mxu1 %v4638_v31 }
0x156a   :  { %3444 = vmatpush1.bf16.msra.mxu1 %v4653_v44 }
0x156b   :  { %3446 = vmatprep.subr.bf16.mxu1 %v4656_v48 }
0x156e   :  { %3448 = vmatpush1.bf16.msra.mxu1 %v4665_v36 }
0x156f   :  { %3450 = vmatprep.subr.bf16.mxu1 %v4606_v20 }
0x1634   :  { %v1733_v38 = vpop.f32.mrb[6].mxu1 }
0x1635   :  { %v1740_v37 = vadd.f32 %v1733_v38, %v4418_v53  ;;  %v1735_v55 = vpop.f32.mrb[7].mxu1 }
0x1636   :  { %v1741_v45 = vadd.f32 %v1735_v55, %v4421_v56 }
0x1637   :  { %v3141_v52 = vmul.f32 -1.442695, %v1740_v37 }
0x1638   :  { %v3142_v61 = vmul.f32 -1.442695, %v1741_v45 }
0x1639   :  { %3869 = vpow2.f32 %v3141_v52 }
0x163a   :  { %3871 = vtanh.f32 %v1741_v45 }
0x1643   :  { %v3870_v47 = vpop.eup %3869 }
0x1644   :  { %v1748_v14 = vadd.f32 1.0, %v3870_v47  ;;  %v3872_v57 = vpop.eup %3871 }
0x1646   :  { %3873 = vrcp.f32 %v1748_v14 }
0x1647   :  { %3875 = vpow2.f32 %v3142_v61 }
0x1650   :  { %v3874_v40 = vpop.eup %3873 }
0x1651   :  { %v1756_v43 = vmul.f32 %v3874_v40, %v3872_v57  ;;  %v3876_v63 = vpop.eup %3875  ;;  %v1755_v18 = vmul.f32 %v3874_v40, %v1659_v16 }
0x1652   :  { %v1749_v42 = vadd.f32 1.0, %v3876_v63 }
0x1653   :  { %1758 = vrot.lane.b32.xlu0 %v1756_v43, %s4026_s4 }
0x1654   :  { %3877 = vrcp.f32 %v1749_v42 }
0x165e   :  { %v3878_v56 = vpop.eup %3877 }
0x16c5   :  { %v1759_v53 = vpop.permute.xlu0 %1758 }
0x16c6   :  { %v1761_v8 = vadd.f32 %v1759_v53, %v1755_v18 }
0x16c8   :  { %3879 = vtanh.f32 %v1761_v8 }
0x16d2   :  { %v3880_v1 = vpop.eup %3879 }
0x16d3   :  { %v1763_v25 = vmul.f32 %v3880_v1, %v3878_v56 }
0x16d5   :  { %1765 = vrot.lane.b32.xlu1 %v1763_v25, %s4026_s4 }
0x1747   :  { %v1766_v23 = vpop.permute.xlu1 %1765 }
0x1748   :  { %3143 = vmatmul.mubr.msk.f32.vlgmr.msra.gmra.mrb[8].mxu1 %vm71_vm0, %v1766_v23 }
0x1749   :  { %3452 = vmatpush1.bf16.msra.mxu1 %v4617_v9  ;;  %1935 = vmatprep.mubr.f32.mxu1 %v4025_v3 }
0x174a   :  { %3454 = vmatprep.subr.bf16.mxu1 %v4619_v10 }
0x174d   :  { %3456 = vmatpush1.bf16.msra.mxu1 %v4635_v29 }
0x174e   :  { %3458 = vmatprep.subr.bf16.mxu1 %v4638_v31 }
0x1751   :  { %3460 = vmatpush1.bf16.msra.mxu1 %v4653_v44 }
0x1752   :  { %3462 = vmatprep.subr.bf16.mxu1 %v4656_v48 }
0x1755   :  { %3464 = vmatpush1.bf16.msra.mxu1 %v4665_v36 }
0x1756   :  { %3466 = vmatprep.subr.bf16.mxu1 %v4606_v20 }
0x181b   :  { %v1835_v2 = vpop.f32.mrb[8].mxu1 }
0x181c   :  { %v1842_v27 = vadd.f32 %v1835_v2, %v4424_v58  ;;  %v1837_v39 = vpop.f32.mrb[9].mxu1 }
0x181d   :  { %v1843_v35 = vadd.f32 %v1837_v39, %v4427_v60 }
0x181e   :  { %v3144_v6 = vmul.f32 -1.442695, %v1842_v27 }
0x181f   :  { %v3145_v33 = vmul.f32 -1.442695, %v1843_v35 }
0x1820   :  { %3881 = vpow2.f32 %v3144_v6 }
0x1821   :  { %3883 = vtanh.f32 %v1843_v35 }
0x182a   :  { %v3882_v49 = vpop.eup %3881 }
0x182b   :  { %v1850_v16 = vadd.f32 1.0, %v3882_v49  ;;  %v3884_v51 = vpop.eup %3883 }
0x182d   :  { %3885 = vrcp.f32 %v1850_v16 }
0x182e   :  { %3887 = vpow2.f32 %v3145_v33 }
0x1837   :  { %v3886_v17 = vpop.eup %3885 }
0x1838   :  { %v1858_v21 = vmul.f32 %v3886_v17, %v3884_v51  ;;  %v3888_v38 = vpop.eup %3887  ;;  %v1857_v55 = vmul.f32 %v3886_v17, %v1761_v8 }
0x1839   :  { %v1851_v37 = vadd.f32 1.0, %v3888_v38 }
0x183a   :  { %1860 = vrot.lane.b32.xlu0 %v1858_v21, %s4026_s4 }
0x183b   :  { %3889 = vrcp.f32 %v1851_v37 }
0x1845   :  { %v3890_v60 = vpop.eup %3889 }
0x18ac   :  { %v1861_v58 = vpop.permute.xlu0 %1860 }
0x18ad   :  { %v1863_v45 = vadd.f32 %v1861_v58, %v1857_v55 }
0x18af   :  { %3891 = vtanh.f32 %v1863_v45 }
0x18b9   :  { %v3892_v52 = vpop.eup %3891 }
0x18ba   :  { %v1865_v47 = vmul.f32 %v3892_v52, %v3890_v60 }
0x18bc   :  { %1867 = vrot.lane.b32.xlu1 %v1865_v47, %s4026_s4 }
0x192e   :  { %v1868_v14 = vpop.permute.xlu1 %1867 }
0x192f   :  { %3146 = vmatmul.mubr.msk.f32.vlgmr.msra.gmra.mrb[10].mxu1 %vm71_vm0, %v1868_v14 }
0x1930   :  { %3468 = vmatpush1.bf16.msra.mxu1 %v4617_v9  ;;  %2037 = vmatprep.mubr.f32.mxu1 %v4025_v3 }
0x1931   :  { %3470 = vmatprep.subr.bf16.mxu1 %v4619_v10 }
0x1934   :  { %3472 = vmatpush1.bf16.msra.mxu1 %v4635_v29 }
0x1935   :  { %3474 = vmatprep.subr.bf16.mxu1 %v4638_v31 }
0x1938   :  { %3476 = vmatpush1.bf16.msra.mxu1 %v4653_v44 }
0x1939   :  { %3478 = vmatprep.subr.bf16.mxu1 %v4656_v48 }
0x193c   :  { %3480 = vmatpush1.bf16.msra.mxu1 %v4665_v36 }
0x193d   :  { %3482 = vmatprep.subr.bf16.mxu1 %v4606_v20 }
0x1a02   :  { %v1937_v57 = vpop.f32.mrb[10].mxu1 }
0x1a03   :  { %v1944_v40 = vadd.f32 %v1937_v57, %v4430_v62  ;;  %v1939_v43 = vpop.f32.mrb[11].mxu1 }
0x1a04   :  { %v1945_v61 = vadd.f32 %v1939_v43, %v4433_v0 }
0x1a05   :  { %v3147_v63 = vmul.f32 -1.442695, %v1944_v40 }
0x1a06   :  { %v3148_v1 = vmul.f32 -1.442695, %v1945_v61 }
0x1a07   :  { %3893 = vpow2.f32 %v3147_v63 }
0x1a08   :  { %3895 = vtanh.f32 %v1945_v61 }
0x1a11   :  { %v3894_v42 = vpop.eup %3893 }
0x1a12   :  { %v1952_v18 = vadd.f32 1.0, %v3894_v42  ;;  %v3896_v53 = vpop.eup %3895 }
0x1a14   :  { %3897 = vrcp.f32 %v1952_v18 }
0x1a15   :  { %3899 = vpow2.f32 %v3148_v1 }
0x1a1e   :  { %v3898_v8 = vpop.eup %3897 }
0x1a1f   :  { %v1960_v56 = vmul.f32 %v3898_v8, %v3896_v53  ;;  %v3900_v25 = vpop.eup %3899  ;;  %v1959_v2 = vmul.f32 %v3898_v8, %v1863_v45 }
0x1a20   :  { %v1953_v23 = vadd.f32 1.0, %v3900_v25 }
0x1a21   :  { %1962 = vrot.lane.b32.xlu0 %v1960_v56, %s4026_s4 }
0x1a22   :  { %3901 = vrcp.f32 %v1953_v23 }
0x1a2c   :  { %v3902_v0 = vpop.eup %3901 }
0x1a93   :  { %v1963_v62 = vpop.permute.xlu0 %1962 }
0x1a94   :  { %v1965_v27 = vadd.f32 %v1963_v62, %v1959_v2 }
0x1a96   :  { %3903 = vtanh.f32 %v1965_v27 }
0x1aa0   :  { %v3904_v39 = vpop.eup %3903 }
0x1aa1   :  { %v1967_v35 = vmul.f32 %v3904_v39, %v3902_v0 }
0x1aa3   :  { %1969 = vrot.lane.b32.xlu1 %v1967_v35, %s4026_s4 }
0x1b15   :  { %v1970_v6 = vpop.permute.xlu1 %1969 }
0x1b16   :  { %3149 = vmatmul.mubr.msk.f32.vlgmr.msra.gmra.mrb[12].mxu1 %vm71_vm0, %v1970_v6 }
0x1b17   :  { %3484 = vmatpush1.bf16.msra.mxu1 %v4617_v9  ;;  %2139 = vmatprep.mubr.f32.mxu1 %v4025_v3 }
0x1b18   :  { %3486 = vmatprep.subr.bf16.mxu1 %v4619_v10 }
0x1b1b   :  { %3488 = vmatpush1.bf16.msra.mxu1 %v4635_v29 }
0x1b1c   :  { %3490 = vmatprep.subr.bf16.mxu1 %v4638_v31 }
0x1b1f   :  { %3492 = vmatpush1.bf16.msra.mxu1 %v4653_v44 }
0x1b20   :  { %3494 = vmatprep.subr.bf16.mxu1 %v4656_v48 }
0x1b23   :  { %3496 = vmatpush1.bf16.msra.mxu1 %v4665_v36 }
0x1b24   :  { %3498 = vmatprep.subr.bf16.mxu1 %v4606_v20 }
0x1be9   :  { %v2039_v49 = vpop.f32.mrb[12].mxu1 }
0x1bea   :  { %v2046_v16 = vadd.f32 %v2039_v49, %v4436_v5  ;;  %v2041_v51 = vpop.f32.mrb[13].mxu1 }
0x1beb   :  { %v2047_v17 = vadd.f32 %v2041_v51, %v4439_v7 }
0x1bec   :  { %v3150_v21 = vmul.f32 -1.442695, %v2046_v16 }
0x1bed   :  { %v3151_v45 = vmul.f32 -1.442695, %v2047_v17 }
0x1bee   :  { %3905 = vpow2.f32 %v3150_v21 }
0x1bef   :  { %3907 = vtanh.f32 %v2047_v17 }
0x1bf8   :  { %v3906_v33 = vpop.eup %3905 }
0x1bf9   :  { %v2054_v38 = vadd.f32 1.0, %v3906_v33  ;;  %v3908_v37 = vpop.eup %3907 }
0x1bfb   :  { %3909 = vrcp.f32 %v2054_v38 }
0x1bfc   :  { %3911 = vpow2.f32 %v3151_v45 }
0x1c05   :  { %v3910_v55 = vpop.eup %3909 }
0x1c06   :  { %v2062_v58 = vmul.f32 %v3910_v55, %v3908_v37  ;;  %v3912_v60 = vpop.eup %3911  ;;  %v2061_v47 = vmul.f32 %v3910_v55, %v1965_v27 }
0x1c07   :  { %v2055_v52 = vadd.f32 1.0, %v3912_v60 }
0x1c08   :  { %2064 = vrot.lane.b32.xlu0 %v2062_v58, %s4026_s4 }
0x1c09   :  { %3913 = vrcp.f32 %v2055_v52 }
0x1c13   :  { %v3914_v7 = vpop.eup %3913 }
0x1c7a   :  { %v2065_v5 = vpop.permute.xlu0 %2064 }
0x1c7b   :  { %v2067_v14 = vadd.f32 %v2065_v5, %v2061_v47 }
0x1c7d   :  { %3915 = vtanh.f32 %v2067_v14 }
0x1c87   :  { %v3916_v57 = vpop.eup %3915 }
0x1c88   :  { %v2069_v40 = vmul.f32 %v3916_v57, %v3914_v7 }
0x1c8a   :  { %2071 = vrot.lane.b32.xlu1 %v2069_v40, %s4026_s4 }
0x1cfc   :  { %v2072_v43 = vpop.permute.xlu1 %2071 }
0x1cfd   :  { %3152 = vmatmul.mubr.msk.f32.vlgmr.msra.gmra.mrb[14].mxu1 %vm71_vm0, %v2072_v43 }
0x1cfe   :  { %3500 = vmatpush1.bf16.msra.mxu1 %v4617_v9  ;;  %2241 = vmatprep.mubr.f32.mxu1 %v4025_v3 }
0x1cff   :  { %3502 = vmatprep.subr.bf16.mxu1 %v4619_v10 }
0x1d02   :  { %3504 = vmatpush1.bf16.msra.mxu1 %v4635_v29 }
0x1d03   :  { %3506 = vmatprep.subr.bf16.mxu1 %v4638_v31 }
0x1d06   :  { %3508 = vmatpush1.bf16.msra.mxu1 %v4653_v44 }
0x1d07   :  { %3510 = vmatprep.subr.bf16.mxu1 %v4656_v48 }
0x1d0a   :  { %3512 = vmatpush1.bf16.msra.mxu1 %v4665_v36 }
0x1d0b   :  { %3514 = vmatprep.subr.bf16.mxu1 %v4606_v20 }
0x1dd0   :  { %v2141_v61 = vpop.f32.mrb[14].mxu1 }
0x1dd1   :  { %v2148_v63 = vadd.f32 %v2141_v61, %v4442_v11  ;;  %v2143_v42 = vpop.f32.mrb[15].mxu1 }
0x1dd2   :  { %v2149_v18 = vadd.f32 %v2143_v42, %v4445_v13 }
0x1dd3   :  { %v3153_v53 = vmul.f32 -1.442695, %v2148_v63 }
0x1dd4   :  { %v3154_v2 = vmul.f32 -1.442695, %v2149_v18 }
0x1dd5   :  { %3917 = vpow2.f32 %v3153_v53 }
0x1dd6   :  { %3919 = vtanh.f32 %v2149_v18 }
0x1ddf   :  { %v3918_v8 = vpop.eup %3917 }
0x1de0   :  { %v2156_v56 = vadd.f32 1.0, %v3918_v8  ;;  %v3920_v1 = vpop.eup %3919 }
0x1de2   :  { %3921 = vrcp.f32 %v2156_v56 }
0x1de3   :  { %3923 = vpow2.f32 %v3154_v2 }
0x1dec   :  { %v3922_v25 = vpop.eup %3921 }
0x1ded   :  { %v2164_v23 = vmul.f32 %v3922_v25, %v3920_v1  ;;  %v3924_v62 = vpop.eup %3923  ;;  %v2163_v0 = vmul.f32 %v3922_v25, %v2067_v14 }
0x1dee   :  { %v2157_v27 = vadd.f32 1.0, %v3924_v62 }
0x1def   :  { %2166 = vrot.lane.b32.xlu0 %v2164_v23, %s4026_s4 }
0x1df0   :  { %3925 = vrcp.f32 %v2157_v27 }
0x1dfa   :  { %v3926_v13 = vpop.eup %3925 }
0x1e61   :  { %v2167_v11 = vpop.permute.xlu0 %2166 }
0x1e62   :  { %v2169_v39 = vadd.f32 %v2167_v11, %v2163_v0 }
0x1e64   :  { %3927 = vtanh.f32 %v2169_v39 }
0x1e6e   :  { %v3928_v35 = vpop.eup %3927 }
0x1e6f   :  { %v2171_v6 = vmul.f32 %v3928_v35, %v3926_v13 }
0x1e71   :  { %2173 = vrot.lane.b32.xlu1 %v2171_v6, %s4026_s4 }
0x1ee3   :  { %v2174_v49 = vpop.permute.xlu1 %2173 }
0x1ee4   :  { %3155 = vmatmul.mubr.msk.f32.vlgmr.msra.gmra.mrb[16].mxu1 %vm71_vm0, %v2174_v49 }
0x1ee5   :  { %3516 = vmatpush1.bf16.msra.mxu1 %v4617_v9  ;;  %2343 = vmatprep.mubr.f32.mxu1 %v4025_v3 }
0x1ee6   :  { %3518 = vmatprep.subr.bf16.mxu1 %v4619_v10 }
0x1ee9   :  { %3520 = vmatpush1.bf16.msra.mxu1 %v4635_v29 }
0x1eea   :  { %3522 = vmatprep.subr.bf16.mxu1 %v4638_v31 }
0x1eed   :  { %3524 = vmatpush1.bf16.msra.mxu1 %v4653_v44 }
0x1eee   :  { %3526 = vmatprep.subr.bf16.mxu1 %v4656_v48 }
0x1ef1   :  { %3528 = vmatpush1.bf16.msra.mxu1 %v4665_v36 }
0x1ef2   :  { %3530 = vmatprep.subr.bf16.mxu1 %v4606_v20 }
0x1fb7   :  { %v2243_v16 = vpop.f32.mrb[16].mxu1 }
0x1fb8   :  { %v2250_v51 = vadd.f32 %v2243_v16, %v4448_v15  ;;  %v2245_v17 = vpop.f32.mrb[17].mxu1 }
0x1fb9   :  { %v2251_v21 = vadd.f32 %v2245_v17, %v4451_v19 }
0x1fba   :  { %v3156_v33 = vmul.f32 -1.442695, %v2250_v51 }
0x1fbb   :  { %v3157_v60 = vmul.f32 -1.442695, %v2251_v21 }
0x1fbc   :  { %3929 = vpow2.f32 %v3156_v33 }
0x1fbd   :  { %3931 = vtanh.f32 %v2251_v21 }
0x1fc6   :  { %v3930_v38 = vpop.eup %3929 }
0x1fc7   :  { %v2258_v37 = vadd.f32 1.0, %v3930_v38  ;;  %v3932_v55 = vpop.eup %3931 }
0x1fc9   :  { %3933 = vrcp.f32 %v2258_v37 }
0x1fca   :  { %3935 = vpow2.f32 %v3157_v60 }
0x1fd3   :  { %v3934_v58 = vpop.eup %3933 }
0x1fd4   :  { %v2266_v45 = vmul.f32 %v3934_v58, %v3932_v55  ;;  %v3936_v52 = vpop.eup %3935  ;;  %v2265_v5 = vmul.f32 %v3934_v58, %v2169_v39 }
0x1fd5   :  { %v2259_v47 = vadd.f32 1.0, %v3936_v52 }
0x1fd6   :  { %2268 = vrot.lane.b32.xlu0 %v2266_v45, %s4026_s4 }
0x1fd7   :  { %3937 = vrcp.f32 %v2259_v47 }
0x1fe1   :  { %v3938_v19 = vpop.eup %3937 }
0x2048   :  { %v2269_v15 = vpop.permute.xlu0 %2268 }
0x2049   :  { %v2271_v14 = vadd.f32 %v2269_v15, %v2265_v5 }
0x204b   :  { %3939 = vtanh.f32 %v2271_v14 }
0x2055   :  { %v3940_v7 = vpop.eup %3939 }
0x2056   :  { %v2273_v57 = vmul.f32 %v3940_v7, %v3938_v19 }
0x2058   :  { %2275 = vrot.lane.b32.xlu1 %v2273_v57, %s4026_s4 }
0x20ca   :  { %v2276_v40 = vpop.permute.xlu1 %2275 }
0x20cb   :  { %3158 = vmatmul.mubr.msk.f32.vlgmr.msra.gmra.mrb[18].mxu1 %vm71_vm0, %v2276_v40 }
0x20cc   :  { %3532 = vmatpush1.bf16.msra.mxu1 %v4617_v9  ;;  %2445 = vmatprep.mubr.f32.mxu1 %v4025_v3 }
0x20cd   :  { %3534 = vmatprep.subr.bf16.mxu1 %v4619_v10 }
0x20d0   :  { %3536 = vmatpush1.bf16.msra.mxu1 %v4635_v29 }
0x20d1   :  { %3538 = vmatprep.subr.bf16.mxu1 %v4638_v31 }
0x20d4   :  { %3540 = vmatpush1.bf16.msra.mxu1 %v4653_v44 }
0x20d5   :  { %3542 = vmatprep.subr.bf16.mxu1 %v4656_v48 }
0x20d8   :  { %3544 = vmatpush1.bf16.msra.mxu1 %v4665_v36 }
0x20d9   :  { %3546 = vmatprep.subr.bf16.mxu1 %v4606_v20 }
0x219e   :  { %v2345_v43 = vpop.f32.mrb[18].mxu1 }
0x219f   :  { %v2352_v61 = vadd.f32 %v2345_v43, %v4454_v22  ;;  %v2347_v63 = vpop.f32.mrb[19].mxu1 }
0x21a0   :  { %v2353_v42 = vadd.f32 %v2347_v63, %v4457_v24 }
0x21a1   :  { %v3159_v18 = vmul.f32 -1.442695, %v2352_v61 }
0x21a2   :  { %v3160_v23 = vmul.f32 -1.442695, %v2353_v42 }
0x21a3   :  { %3941 = vpow2.f32 %v3159_v18 }
0x21a4   :  { %3943 = vtanh.f32 %v2353_v42 }
0x21ad   :  { %v3942_v53 = vpop.eup %3941 }
0x21ae   :  { %v2360_v8 = vadd.f32 1.0, %v3942_v53  ;;  %v3944_v56 = vpop.eup %3943 }
0x21b0   :  { %3945 = vrcp.f32 %v2360_v8 }
0x21b1   :  { %3947 = vpow2.f32 %v3160_v23 }
0x21ba   :  { %v3946_v1 = vpop.eup %3945 }
0x21bb   :  { %v2368_v25 = vmul.f32 %v3946_v1, %v3944_v56  ;;  %v3948_v2 = vpop.eup %3947  ;;  %v2367_v27 = vmul.f32 %v3946_v1, %v2271_v14 }
0x21bc   :  { %v2361_v62 = vadd.f32 1.0, %v3948_v2 }
0x21bd   :  { %2370 = vrot.lane.b32.xlu0 %v2368_v25, %s4026_s4 }
0x21be   :  { %3949 = vrcp.f32 %v2361_v62 }
0x21c8   :  { %v3950_v24 = vpop.eup %3949 }
0x222f   :  { %v2371_v22 = vpop.permute.xlu0 %2370 }
0x2230   :  { %v2373_v0 = vadd.f32 %v2371_v22, %v2367_v27 }
0x2232   :  { %3951 = vtanh.f32 %v2373_v0 }
0x223c   :  { %v3952_v11 = vpop.eup %3951 }
0x223d   :  { %v2375_v39 = vmul.f32 %v3952_v11, %v3950_v24 }
0x223f   :  { %2377 = vrot.lane.b32.xlu1 %v2375_v39, %s4026_s4 }
0x22b1   :  { %v2378_v13 = vpop.permute.xlu1 %2377 }
0x22b2   :  { %3161 = vmatmul.mubr.msk.f32.vlgmr.msra.gmra.mrb[20].mxu1 %vm71_vm0, %v2378_v13 }
0x22b3   :  { %3548 = vmatpush1.bf16.msra.mxu1 %v4617_v9  ;;  %2547 = vmatprep.mubr.f32.mxu1 %v4025_v3 }
0x22b4   :  { %3550 = vmatprep.subr.bf16.mxu1 %v4619_v10 }
0x22b7   :  { %3552 = vmatpush1.bf16.msra.mxu1 %v4635_v29 }
0x22b8   :  { %3554 = vmatprep.subr.bf16.mxu1 %v4638_v31 }
0x22bb   :  { %3556 = vmatpush1.bf16.msra.mxu1 %v4653_v44 }
0x22bc   :  { %3558 = vmatprep.subr.bf16.mxu1 %v4656_v48 }
0x22bf   :  { %3560 = vmatpush1.bf16.msra.mxu1 %v4665_v36 }
0x22c0   :  { %3562 = vmatprep.subr.bf16.mxu1 %v4606_v20 }
0x2385   :  { %v2447_v35 = vpop.f32.mrb[20].mxu1 }
0x2386   :  { %v2454_v6 = vadd.f32 %v2447_v35, %v4460_v26  ;;  %v2449_v49 = vpop.f32.mrb[21].mxu1 }
0x2387   :  { %v2455_v16 = vadd.f32 %v2449_v49, %v4463_v28 }
0x2388   :  { %v3162_v51 = vmul.f32 -1.442695, %v2454_v6 }
0x2389   :  { %v3163_v55 = vmul.f32 -1.442695, %v2455_v16 }
0x238a   :  { %3953 = vpow2.f32 %v3162_v51 }
0x238b   :  { %3955 = vtanh.f32 %v2455_v16 }
0x2394   :  { %v3954_v17 = vpop.eup %3953 }
0x2395   :  { %v2462_v21 = vadd.f32 1.0, %v3954_v17  ;;  %v3956_v33 = vpop.eup %3955 }
0x2397   :  { %3957 = vrcp.f32 %v2462_v21 }
0x2398   :  { %3959 = vpow2.f32 %v3163_v55 }
0x23a1   :  { %v3958_v38 = vpop.eup %3957 }
0x23a2   :  { %v2470_v37 = vmul.f32 %v3958_v38, %v3956_v33  ;;  %v3960_v58 = vpop.eup %3959  ;;  %v2469_v60 = vmul.f32 %v3958_v38, %v2373_v0 }
0x23a3   :  { %v2463_v45 = vadd.f32 1.0, %v3960_v58 }
0x23a4   :  { %2472 = vrot.lane.b32.xlu0 %v2470_v37, %s4026_s4 }
0x23a5   :  { %3961 = vrcp.f32 %v2463_v45 }
0x23af   :  { %v3962_v28 = vpop.eup %3961 }
0x2416   :  { %v2473_v26 = vpop.permute.xlu0 %2472 }
0x2417   :  { %v2475_v52 = vadd.f32 %v2473_v26, %v2469_v60 }
0x2419   :  { %3963 = vtanh.f32 %v2475_v52 }
0x2423   :  { %v3964_v47 = vpop.eup %3963 }
0x2424   :  { %v2477_v5 = vmul.f32 %v3964_v47, %v3962_v28 }
0x2426   :  { %2479 = vrot.lane.b32.xlu1 %v2477_v5, %s4026_s4 }
0x2498   :  { %v2480_v15 = vpop.permute.xlu1 %2479 }
0x2499   :  { %3164 = vmatmul.mubr.msk.f32.vlgmr.msra.gmra.mrb[22].mxu1 %vm71_vm0, %v2480_v15 }
0x249a   :  { %3564 = vmatpush1.bf16.msra.mxu1 %v4617_v9  ;;  %2649 = vmatprep.mubr.f32.mxu1 %v4025_v3 }
0x249b   :  { %3566 = vmatprep.subr.bf16.mxu1 %v4619_v10 }
0x249e   :  { %3568 = vmatpush1.bf16.msra.mxu1 %v4635_v29 }
0x249f   :  { %3570 = vmatprep.subr.bf16.mxu1 %v4638_v31 }
0x24a2   :  { %3572 = vmatpush1.bf16.msra.mxu1 %v4653_v44 }
0x24a3   :  { %3574 = vmatprep.subr.bf16.mxu1 %v4656_v48 }
0x24a6   :  { %3576 = vmatpush1.bf16.msra.mxu1 %v4665_v36 }
0x24a7   :  { %3578 = vmatprep.subr.bf16.mxu1 %v4606_v20 }
0x256c   :  { %v2549_v14 = vpop.f32.mrb[22].mxu1 }
0x256d   :  { %v2556_v19 = vadd.f32 %v2549_v14, %v4466_v30  ;;  %v2551_v7 = vpop.f32.mrb[23].mxu1 }
0x256e   :  { %v2557_v57 = vadd.f32 %v2551_v7, %v4469_v32 }
0x256f   :  { %v3165_v40 = vmul.f32 -1.442695, %v2556_v19 }
0x2570   :  { %v3166_v53 = vmul.f32 -1.442695, %v2557_v57 }
0x2571   :  { %3965 = vpow2.f32 %v3165_v40 }
0x2572   :  { %3967 = vtanh.f32 %v2557_v57 }
0x257b   :  { %v3966_v43 = vpop.eup %3965 }
0x257c   :  { %v2564_v61 = vadd.f32 1.0, %v3966_v43  ;;  %v3968_v63 = vpop.eup %3967 }
0x257e   :  { %3969 = vrcp.f32 %v2564_v61 }
0x257f   :  { %3971 = vpow2.f32 %v3166_v53 }
0x2588   :  { %v3970_v42 = vpop.eup %3969 }
0x2589   :  { %v2572_v18 = vmul.f32 %v3970_v42, %v3968_v63  ;;  %v3972_v8 = vpop.eup %3971  ;;  %v2571_v1 = vmul.f32 %v3970_v42, %v2475_v52 }
0x258a   :  { %v2565_v56 = vadd.f32 1.0, %v3972_v8 }
0x258b   :  { %2574 = vrot.lane.b32.xlu0 %v2572_v18, %s4026_s4 }
0x258c   :  { %3973 = vrcp.f32 %v2565_v56 }
0x2596   :  { %v3974_v32 = vpop.eup %3973 }
0x25fd   :  { %v2575_v30 = vpop.permute.xlu0 %2574 }
0x25fe   :  { %v2577_v25 = vadd.f32 %v2575_v30, %v2571_v1 }
0x2600   :  { %3975 = vtanh.f32 %v2577_v25 }
0x260a   :  { %v3976_v23 = vpop.eup %3975 }
0x260b   :  { %v2579_v2 = vmul.f32 %v3976_v23, %v3974_v32 }
0x260d   :  { %2581 = vrot.lane.b32.xlu1 %v2579_v2, %s4026_s4 }
0x267f   :  { %v2582_v62 = vpop.permute.xlu1 %2581 }
0x2680   :  { %3167 = vmatmul.mubr.msk.f32.vlgmr.msra.gmra.mrb[24].mxu1 %vm71_vm0, %v2582_v62 }
0x2681   :  { %3580 = vmatpush1.bf16.msra.mxu1 %v4617_v9  ;;  %2751 = vmatprep.mubr.f32.mxu1 %v4025_v3 }
0x2682   :  { %3582 = vmatprep.subr.bf16.mxu1 %v4619_v10 }
0x2685   :  { %3584 = vmatpush1.bf16.msra.mxu1 %v4635_v29 }
0x2686   :  { %3586 = vmatprep.subr.bf16.mxu1 %v4638_v31 }
0x2689   :  { %3588 = vmatpush1.bf16.msra.mxu1 %v4653_v44 }
0x268a   :  { %3590 = vmatprep.subr.bf16.mxu1 %v4656_v48 }
0x268d   :  { %3592 = vmatpush1.bf16.msra.mxu1 %v4665_v36 }
0x268e   :  { %3594 = vmatprep.subr.bf16.mxu1 %v4606_v20 }
0x2753   :  { %v2651_v27 = vpop.f32.mrb[24].mxu1 }
0x2754   :  { %v2658_v22 = vadd.f32 %v2651_v27, %v4472_v34  ;;  %v2653_v0 = vpop.f32.mrb[25].mxu1 }
0x2755   :  { %v2659_v24 = vadd.f32 %v2653_v0, %v4475_v41 }
0x2756   :  { %v3168_v11 = vmul.f32 -1.442695, %v2658_v22 }
0x2757   :  { %v3169_v16 = vmul.f32 -1.442695, %v2659_v24 }
0x2758   :  { %3977 = vpow2.f32 %v3168_v11 }
0x2759   :  { %3979 = vtanh.f32 %v2659_v24 }
0x2762   :  { %v3978_v39 = vpop.eup %3977 }
0x2763   :  { %v2666_v13 = vadd.f32 1.0, %v3978_v39  ;;  %v3980_v35 = vpop.eup %3979 }
0x2765   :  { %3981 = vrcp.f32 %v2666_v13 }
0x2766   :  { %3983 = vpow2.f32 %v3169_v16  ;;  %v2990_v16 = vld [vmem:[%s4926_s8 + $0x10] sm:$0xff] }
0x276f   :  { %v3982_v6 = vpop.eup %3981 }
0x2770   :  { %v2674_v49 = vmul.f32 %v3982_v6, %v3980_v35  ;;  %v3984_v51 = vpop.eup %3983  ;;  %v2673_v21 = vmul.f32 %v3982_v6, %v2577_v25 }
0x2771   :  { %v2667_v17 = vadd.f32 1.0, %v3984_v51 }
0x2772   :  { %2676 = vrot.lane.b32.xlu0 %v2674_v49, %s4026_s4  ;;  %v4027_v49 = vmov 0.0|0.0  }
0x2773   :  { %3985 = vrcp.f32 %v2667_v17  ;;  %3625 = vmatprep.subr.bf16.mxu0 %v4027_v49  ;;  %v2991_v17 = vld [vmem:[%s4926_s8 + $0x18] sm:$0xff] }
0x277d   :  { %v3986_v41 = vpop.eup %3985 }
0x27e4   :  { %v2677_v34 = vpop.permute.xlu0 %2676 }
0x27e5   :  { %v2679_v33 = vadd.f32 %v2677_v34, %v2673_v21  ;;  %v3629_v21 = vpack.c.bf16 %v2991_v17, %v2990_v16  ;;  %v2992_v34 = vld [vmem:[%s4926_s8 + $0x20] sm:$0xff] }
0x27e7   :  { %3987 = vtanh.f32 %v2679_v33 }
0x27f1   :  { %v3988_v38 = vpop.eup %3987 }
0x27f2   :  { %v2681_v37 = vmul.f32 %v3988_v38, %v3986_v41  ;;  %v2995_v38 = vld [vmem:[%s4926_s8 + $0x38] sm:$0xff] }
0x27f4   :  { %2683 = vrot.lane.b32.xlu1 %v2681_v37, %s4026_s4 }
0x2866   :  { %v2684_v55 = vpop.permute.xlu1 %2683 }
0x2867   :  { %3170 = vmatmul.mubr.msk.f32.vlgmr.msra.gmra.mrb[26].mxu1 %vm71_vm0, %v2684_v55 }
0x2868   :  { %3596 = vmatpush1.bf16.msra.mxu1 %v4617_v9  ;;  %2853 = vmatprep.mubr.f32.mxu1 %v4025_v3 }
0x2869   :  { %3598 = vmatprep.subr.bf16.mxu1 %v4619_v10 }
0x286c   :  { %3600 = vmatpush1.bf16.msra.mxu1 %v4635_v29 }
0x286d   :  { %3602 = vmatprep.subr.bf16.mxu1 %v4638_v31 }
0x2870   :  { %3604 = vmatpush1.bf16.msra.mxu1 %v4653_v44 }
0x2871   :  { %3606 = vmatprep.subr.bf16.mxu1 %v4656_v48 }
0x2874   :  { %3608 = vmatpush1.bf16.msra.mxu1 %v4665_v36 }
0x2875   :  { %3610 = vmatprep.subr.bf16.mxu1 %v4606_v20 }
0x293a   :  { %v2753_v58 = vpop.f32.mrb[26].mxu1 }
0x293b   :  { %v2760_v45 = vadd.f32 %v2753_v58, %v4478_v46  ;;  %v2755_v60 = vpop.f32.mrb[27].mxu1 }
0x293c   :  { %v2761_v26 = vadd.f32 %v2755_v60, %v4481_v50 }
0x293d   :  { %v3171_v52 = vmul.f32 -1.442695, %v2760_v45 }
0x293e   :  { %v3172_v19 = vmul.f32 -1.442695, %v2761_v26 }
0x293f   :  { %3989 = vpow2.f32 %v3171_v52 }
0x2940   :  { %3991 = vtanh.f32 %v2761_v26 }
0x2949   :  { %v3990_v28 = vpop.eup %3989 }
0x294a   :  { %v2768_v47 = vadd.f32 1.0, %v3990_v28  ;;  %v3992_v5 = vpop.eup %3991 }
0x294c   :  { %3993 = vrcp.f32 %v2768_v47 }
0x294d   :  { %3995 = vpow2.f32 %v3172_v19 }
0x2956   :  { %v3994_v15 = vpop.eup %3993 }
0x2957   :  { %v2776_v14 = vmul.f32 %v3994_v15, %v3992_v5  ;;  %v3996_v20 = vpop.eup %3995  ;;  %v2775_v57 = vmul.f32 %v3994_v15, %v2679_v33  ;;  %v2993_v33 = vld [vmem:[%s4926_s8 + $0x28] sm:$0xff] }
0x2958   :  { %v2769_v7 = vadd.f32 1.0, %v3996_v20  ;;  %v3632_v41 = vpack.c.bf16 %v2993_v33, %v2992_v34 }
0x2959   :  { %2778 = vrot.lane.b32.xlu0 %v2776_v14, %s4026_s4  ;;  %v3179_v14 = vld [vmem:[%s4927_s9] ss:$0 sm:$0xff] }
0x295a   :  { %3997 = vrcp.f32 %v2769_v7 }
0x2964   :  { %v3998_v50 = vpop.eup %3997 }
0x29cb   :  { %v2779_v46 = vpop.permute.xlu0 %2778 }
0x29cc   :  { %v2781_v40 = vadd.f32 %v2779_v46, %v2775_v57 }
0x29ce   :  { %3999 = vtanh.f32 %v2781_v40 }
0x29d8   :  { %v4000_v43 = vpop.eup %3999 }
0x29d9   :  { %v2783_v61 = vmul.f32 %v4000_v43, %v3998_v50 }
0x29db   :  { %2785 = vrot.lane.b32.xlu1 %v2783_v61, %s4026_s4 }
0x2a4d   :  { %v2786_v63 = vpop.permute.xlu1 %2785 }
0x2a4e   :  { %3173 = vmatmul.mubr.msk.f32.vlgmr.msra.gmra.mrb[28].mxu1 %vm71_vm0, %v2786_v63 }
0x2a4f   :  { %3612 = vmatpush1.bf16.msra.mxu1 %v4617_v9  ;;  %2955 = vmatprep.mubr.f32.mxu1 %v4025_v3  ;;  %v2994_v3 = vld [vmem:[%s4926_s8 + $0x30] sm:$0xff] }
0x2a50   :  { %3614 = vmatprep.subr.bf16.mxu1 %v4619_v10  ;;  %v3635_v37 = vpack.c.bf16 %v2995_v38, %v2994_v3 }
0x2a53   :  { %3616 = vmatpush1.bf16.msra.mxu1 %v4635_v29 }
0x2a54   :  { %3618 = vmatprep.subr.bf16.mxu1 %v4638_v31 }
0x2a57   :  { %3620 = vmatpush1.bf16.msra.mxu1 %v4653_v44 }
0x2a58   :  { %3622 = vmatprep.subr.bf16.mxu1 %v4656_v48 }
0x2a5b   :  { %3624 = vmatpush1.bf16.msra.mxu1 %v4665_v36 }
0x2b21   :  { %v2855_v42 = vpop.f32.mrb[28].mxu1 }
0x2b22   :  { %v2862_v18 = vadd.f32 %v2855_v42, %v4484_v54  ;;  %v2857_v53 = vpop.f32.mrb[29].mxu1 }
0x2b23   :  { %v2863_v9 = vadd.f32 %v2857_v53, %v4487_v59 }
0x2b24   :  { %v3174_v8 = vmul.f32 -1.442695, %v2862_v18 }
0x2b25   :  { %v3175_v44 = vmul.f32 -1.442695, %v2863_v9 }
0x2b26   :  { %4001 = vpow2.f32 %v3174_v8 }
0x2b27   :  { %4003 = vtanh.f32 %v2863_v9 }
0x2b30   :  { %v4002_v56 = vpop.eup %4001 }
0x2b31   :  { %v2870_v10 = vadd.f32 1.0, %v4002_v56  ;;  %v4004_v29 = vpop.eup %4003 }
0x2b33   :  { %4005 = vrcp.f32 %v2870_v10 }
0x2b34   :  { %4007 = vpow2.f32 %v3175_v44 }
0x2b3d   :  { %v4006_v31 = vpop.eup %4005 }
0x2b3e   :  { %v2878_v1 = vmul.f32 %v4006_v31, %v4004_v29  ;;  %v4008_v48 = vpop.eup %4007  ;;  %v2877_v30 = vmul.f32 %v4006_v31, %v2781_v40 }
0x2b3f   :  { %v2871_v36 = vadd.f32 1.0, %v4008_v48 }
0x2b40   :  { %2880 = vrot.lane.b32.xlu0 %v2878_v1, %s4026_s4 }
0x2b41   :  { %4009 = vrcp.f32 %v2871_v36 }
0x2b4b   :  { %v4010_v59 = vpop.eup %4009 }
0x2bb2   :  { %v2881_v54 = vpop.permute.xlu0 %2880 }
0x2bb3   :  { %v2883_v25 = vadd.f32 %v2881_v54, %v2877_v30 }
0x2bb5   :  { %4011 = vtanh.f32 %v2883_v25 }
0x2bbf   :  { %v4012_v32 = vpop.eup %4011 }
0x2bc0   :  { %v2885_v23 = vmul.f32 %v4012_v32, %v4010_v59 }
0x2bc2   :  { %2887 = vrot.lane.b32.xlu1 %v2885_v23, %s4026_s4 }
0x2c34   :  { %v2888_v2 = vpop.permute.xlu1 %2887 }
0x2c35   :  { %3176 = vmatmul.mubr.msk.f32.vlgmr.msra.gmra.mrb[30].mxu1 %vm71_vm0, %v2888_v2 }
0x2d08   :  { %v2957_v62 = vpop.f32.mrb[30].mxu1 }
0x2d09   :  { %v2964_v27 = vadd.f32 %v2957_v62, %v4493_v4  ;;  %v2959_v22 = vpop.f32.mrb[31].mxu1  ;;  %v2988_v4 = vld [vmem:[%s4926_s8] sm:$0xff] }
0x2d0a   :  { %v2965_v0 = vadd.f32 %v2959_v22, %v4500_v12  ;;  %v2989_v12 = vld [vmem:[%s4926_s8 + $0x8] sm:$0xff] }
0x2d0b   :  { %v3177_v24 = vmul.f32 -1.442695, %v2964_v27  ;;  %v3626_v51 = vpack.c.bf16 %v2989_v12, %v2988_v4 }
0x2d0c   :  { %v3178_v55 = vmul.f32 -1.442695, %v2965_v0 }
0x2d0d   :  { %4013 = vpow2.f32 %v3177_v24  ;;  %3627 = vmatpush3.bf16.msra.mxu0 %v3626_v51 }
0x2d0e   :  { %4015 = vtanh.f32 %v2965_v0  ;;  %3628 = vmatprep.subr.bf16.mxu0 %v4027_v49 }
0x2d11   :  { %3630 = vmatpush3.bf16.msra.mxu0 %v3629_v21 }
0x2d12   :  { %3631 = vmatprep.subr.bf16.mxu0 %v4027_v49 }
0x2d15   :  { %3633 = vmatpush3.bf16.msra.mxu0 %v3632_v41 }
0x2d16   :  { %3634 = vmatprep.subr.bf16.mxu0 %v4027_v49 }
0x2d17   :  { %v4014_v11 = vpop.eup %4013 }
0x2d18   :  { %v2972_v39 = vadd.f32 1.0, %v4014_v11  ;;  %v4016_v13 = vpop.eup %4015 }
0x2d19   :  { %3636 = vmatpush3.bf16.msra.mxu0 %v3635_v37 }
0x2d1a   :  { %4017 = vrcp.f32 %v2972_v39 }
0x2d1b   :  { %4019 = vpow2.f32 %v3178_v55 }
0x2d24   :  { %v4018_v35 = vpop.eup %4017 }
0x2d25   :  { %v2980_v6 = vmul.f32 %v4018_v35, %v4016_v13  ;;  %v4020_v58 = vpop.eup %4019  ;;  %v2979_v60 = vmul.f32 %v4018_v35, %v2883_v25 }
0x2d26   :  { %v2973_v45 = vadd.f32 1.0, %v4020_v58 }
0x2d27   :  { %2982 = vrot.lane.b32.xlu0 %v2980_v6, %s4026_s4 }
0x2d28   :  { %4021 = vrcp.f32 %v2973_v45 }
0x2d32   :  { %v4022_v28 = vpop.eup %4021 }
0x2d99   :  { %v2983_v26 = vpop.permute.xlu0 %2982 }
0x2d9a   :  { %v2985_v52 = vadd.f32 %v2983_v26, %v2979_v60 }
0x2d9c   :  { %4023 = vtanh.f32 %v2985_v52 }
0x2da6   :  { %v4024_v47 = vpop.eup %4023 }
0x2da7   :  { %v2987_v5 = vmul.f32 %v4024_v47, %v4022_v28 }
0x2da9   :  { %3004 = vrot.lane.b32.xlu1 %v2987_v5, %s4026_s4 }
0x2e1b   :  { %v3005_v15 = vpop.permute.xlu1 %3004 }
0x2e1c   :  { %3207 = vmatmul.mubr.msk.f32.vlgmr.msra.gmra.mrb[48].mxu0 %vm71_vm0, %v3005_v15 }
0x2eef   :  { %v3074_v19 = vpop.f32.mrb[48].mxu0 }
0x2ef0   :  { %v3075_v20 = vadd.f32 %v3179_v14, %v3074_v19  ;;  %v3208_v7 = vpop.f32.mrb[49].mxu0 }
0x2ef2   :  { %3079 = vst.msk [vmem:[%s4928_s10] sm:$0xff] %vm3078_vm2, %v3075_v20 }

</bundles_post_ra>
